<compile_context>
chip_gen: v7x
topology: tpu7x:2x2x1
jax: 0.10.0
libtpu: 0.0.40
codegen_flags: <defaults>
</compile_context>

<pallas_src>
import functools

import jax
import jax.numpy as jnp
import numpy as np
from jax import lax
from jax.experimental import pallas as pl
from jax.experimental.pallas import tpu as pltpu


# =============================================================================
# Kernel 1: fused decoder stack (all layers), batch-blocked M
# =============================================================================

def _decoder_stack_kernel(
    # inputs ------------------------------------------------------------------
    x0_ref, enc_ref,
    sa_wq_ref, sa_wk_ref, sa_wv_ref, sa_wo_ref, sa_bo_ref, n0_g_ref, n0_b_ref,
    ca_wq_ref, ca_wk_ref, ca_wv_ref, ca_wo_ref, ca_bo_ref, n1_g_ref, n1_b_ref,
    ff_w1_ref, ff_b1_ref, ff_w2_ref, ff_b2_ref, n2_g_ref, n2_b_ref,
    # output (also the layer-resident activation carry) ------------------------
    hid_ref,
    *, heads, head_dim, eps):
  """One (batch-chunk, layer) grid step of the decoder stack.

  hid_ref: (M, E) f32.  Its block index only depends on the batch chunk, so it
  stays resident in VMEM across the layer axis and is used as the activation
  carry.  This relies on the "parallel" chunk axis being sharded in contiguous
  (chunk, all-layers) order per TensorCore, which is how Pallas megacore
  sharding works today.
  """
  f32, bf16 = jnp.float32, jnp.bfloat16
  layer = pl.program_id(1)

  @pl.when(layer == 0)
  def _init():
    hid_ref[...] = x0_ref[...]

  x = hid_ref[...]                       # (M, E) f32 activation carry
  enc_b = enc_ref[...]                   # (Mk, E) bf16 (pre-cast in wrapper)

  def mha(q_b, kv_b, wq_ref, wk_ref, wv_ref, wo_ref, bo_ref):
    """Multi-head attention.

    wq/wk/wv: (E, E) block-diagonal packing of the shared per-head (d, d)
    projections (softmax 1/sqrt(E) scale folded into wq).  wo: dense output
    projection reshaped to (heads, d, E); the head contraction
        concat_h(ctx_h) @ Wo  ==  sum_h ctx_h @ Wo[h*d:(h+1)*d, :]
    is done head-by-head (identical math, avoids a minor-dim concatenate).
    """
    qh = jnp.dot(q_b, wq_ref[0], preferred_element_type=f32)    # (Mq, E)
    kh = jnp.dot(kv_b, wk_ref[0], preferred_element_type=f32)   # (Mk, E)
    vh = jnp.dot(kv_b, wv_ref[0], preferred_element_type=f32)   # (Mk, E)
    out = jnp.zeros((q_b.shape[0], wo_ref.shape[-1]), f32)
    for h in range(heads):               # heads: small & static
      lo, hi = h * head_dim, (h + 1) * head_dim
      # Contract the head dim of q and k directly (no kh.T / XLU transpose).
      energy = lax.dot_general(qh[:, lo:hi], kh[:, lo:hi],
                               (((1,), (1,)), ((), ())),
                               preferred_element_type=f32)       # (Mq, Mk)
      m = jnp.max(energy, axis=-1, keepdims=True)
      p = jnp.exp(energy - m)
      attn = p * pl.reciprocal(jnp.sum(p, axis=-1, keepdims=True), approx=True)
      ctx_h = jnp.dot(attn, vh[:, lo:hi], preferred_element_type=f32)  # (Mq, d)
      out = out + jnp.dot(ctx_h.astype(bf16), wo_ref[0, h],
                          preferred_element_type=f32)
    return out + bo_ref[0]

  def add_ln(a, b, g_ref, beta_ref):
    y = a + b                             # f32
    mean = jnp.mean(y, axis=-1, keepdims=True)
    var = jnp.mean((y - mean) ** 2, axis=-1, keepdims=True)
    return (y - mean) * lax.rsqrt(var + eps) * g_ref[0] + beta_ref[0]

  # --- DecoderBlock self-attention (reference never applies trg_mask) --------
  x_b = x.astype(bf16)                    # cast once; reused by Q/K/V matmuls
  sa = mha(x_b, x_b, sa_wq_ref, sa_wk_ref, sa_wv_ref, sa_wo_ref, sa_bo_ref)
  query = add_ln(sa, x, n0_g_ref, n0_b_ref)

  # --- TransformerBlock cross-attention (K/V = encoder output) ---------------
  ca = mha(query.astype(bf16), enc_b,
           ca_wq_ref, ca_wk_ref, ca_wv_ref, ca_wo_ref, ca_bo_ref)
  h1 = add_ln(ca, query, n1_g_ref, n1_b_ref)

  # --- Feed-forward -----------------------------------------------------------
  ffh = jnp.maximum(jnp.dot(h1.astype(bf16), ff_w1_ref[0],
                            preferred_element_type=f32) + ff_b1_ref[0], 0.0)
  ff = jnp.dot(ffh.astype(bf16), ff_w2_ref[0],
               preferred_element_type=f32) + ff_b2_ref[0]
  hid_ref[...] = add_ln(ff, h1, n2_g_ref, n2_b_ref)


# =============================================================================
# Kernel 2: vocab projection, tiled over (M tiles, vocab tiles)
# =============================================================================

def _vocab_proj_kernel(x_ref, w_ref, b_ref, out_ref):
  out_ref[...] = (jnp.dot(x_ref[...].astype(jnp.bfloat16), w_ref[...],
                          preferred_element_type=jnp.float32)
                  + b_ref[...]).astype(out_ref.dtype)


# =============================================================================
# Wrapper: packing, tiling choices, two pallas_calls
# =============================================================================

def _pick_tile(total, candidates=(512, 256, 128)):
  for c in candidates:
    if total % c == 0:
      return c
  return total                            # full extent (always legal)


def _nbytes(a):
  return int(np.prod(a.shape)) * a.dtype.itemsize


def decoder_forward(tokens, enc_out, src_mask, trg_mask, params, heads,
                    batch_block=None):
  """Pallas decoder forward.  Masks accepted but unused (matches reference)."""
  del src_mask, trg_mask
  n, lq = tokens.shape
  _, lk, e = enc_out.shape
  d = e // heads
  layers = params["layers"]
  num_layers = len(layers)
  vocab = params["fc_w"].shape[1]
  vpad = ((vocab + 127) // 128) * 128
  f32, bf16 = jnp.float32, jnp.bfloat16

  # ---- batch blocking: collapse batch rows into the matmul M dimension -------
  if batch_block is None:
    bb = min(n, max(1, -(-128 // lq)))     # aim for ~128 MXU rows per step
  else:
    bb = max(1, min(batch_block, n))
  if bb < n and ((bb * lq) % 8 or (bb * lk) % 8):
    bb = n                                 # full-extent blocks always satisfy (8,128)
  nc = -(-n // bb)                         # number of batch chunks
  n_pad = nc * bb
  # TODO(synk): on v7x (2 TensorCores) prefer nc >= 2 so both cores get work.

  if n_pad > n:
    tokens = jnp.concatenate(
        [tokens, jnp.zeros((n_pad - n, lq), tokens.dtype)], axis=0)
    enc_out = jnp.concatenate(
        [enc_out, jnp.zeros((n_pad - n, lk, e), enc_out.dtype)], axis=0)

  # ---- glue (plain JAX): embedding gathers; dropout == identity --------------
  x0 = (params["word_emb"][tokens] +
        params["pos_emb"][jnp.arange(lq)][None, :, :]).astype(f32)
  x0 = x0.reshape(n_pad * lq, e)
  enc = enc_out.astype(bf16).reshape(n_pad * lk, e)

  # ---- weight packing (once per call; tiny) -----------------------------------
  eye = jnp.eye(heads, dtype=f32)
  scale = 1.0 / (e ** 0.5)                 # reference divides energy by sqrt(E)

  def bdiag(w):                            # shared per-head (d,d) -> (E,E)
    return jnp.kron(eye, w)

  def stack(fn, dt):
    return jnp.stack([fn(lp) for lp in layers]).astype(dt)

  sa_wq = stack(lambda lp: bdiag(lp["sa_wq"]) * scale, bf16)
  sa_wk = stack(lambda lp: bdiag(lp["sa_wk"]), bf16)
  sa_wv = stack(lambda lp: bdiag(lp["sa_wv"]), bf16)
  sa_wo = stack(lambda lp: lp["sa_wo"].reshape(heads, d, e), bf16)
  sa_bo = stack(lambda lp: lp["sa_bo"], f32)
  n0_g = stack(lambda lp: lp["n0_g"], f32)
  n0_b = stack(lambda lp: lp["n0_b"], f32)
  ca_wq = stack(lambda lp: bdiag(lp["ca_wq"]) * scale, bf16)
  ca_wk = stack(lambda lp: bdiag(lp["ca_wk"]), bf16)
  ca_wv = stack(lambda lp: bdiag(lp["ca_wv"]), bf16)
  ca_wo = stack(lambda lp: lp["ca_wo"].reshape(heads, d, e), bf16)
  ca_bo = stack(lambda lp: lp["ca_bo"], f32)
  n1_g = stack(lambda lp: lp["n1_g"], f32)
  n1_b = stack(lambda lp: lp["n1_b"], f32)
  ff_w1 = stack(lambda lp: lp["ff_w1"], bf16)
  ff_b1 = stack(lambda lp: lp["ff_b1"], f32)
  ff_w2 = stack(lambda lp: lp["ff_w2"], bf16)
  ff_b2 = stack(lambda lp: lp["ff_b2"], f32)
  n2_g = stack(lambda lp: lp["n2_g"], f32)
  n2_b = stack(lambda lp: lp["n2_b"], f32)

  fc_w = jnp.zeros((e, vpad), bf16).at[:, :vocab].set(params["fc_w"].astype(bf16))
  fc_b = jnp.zeros((1, vpad), f32).at[:, :vocab].set(params["fc_b"])

  stacked_inputs = [sa_wq, sa_wk, sa_wv, sa_wo, sa_bo, n0_g, n0_b,
                    ca_wq, ca_wk, ca_wv, ca_wo, ca_bo, n1_g, n1_b,
                    ff_w1, ff_b1, ff_w2, ff_b2, n2_g, n2_b]

  # ---- kernel 1: decoder stack ------------------------------------------------
  mq, mk = bb * lq, bb * lk

  def stacked_spec(shape):                 # per-layer weight, indexed by layer id
    return pl.BlockSpec((1,) + shape, lambda b, l: (l,) + (0,) * len(shape))

  in_specs = [pl.BlockSpec((mq, e), lambda b, l: (b, 0)),     # x0
              pl.BlockSpec((mk, e), lambda b, l: (b, 0))]     # enc (bf16)
  in_specs += [stacked_spec(w.shape[1:]) for w in stacked_inputs]

  # scoped-VMEM budget: per-step blocks x2 (double buffering) + headroom,
  # capped at 64 MiB so the same request is legal on v7x as well.
  per_step = (_nbytes(x0) + _nbytes(enc) + n_pad * lq * e * 4) // nc
  per_step += sum(_nbytes(w) for w in stacked_inputs) // num_layers
  vmem_limit = int(min(max(2 * per_step + (8 << 20), 32 << 20), 64 << 20))

  kernel = functools.partial(_decoder_stack_kernel, heads=heads, head_dim=d,
                             eps=1e-5)

  hidden = pl.pallas_call(
      kernel,
      out_shape=jax.ShapeDtypeStruct((n_pad * lq, e), f32),
      grid=(nc, num_layers),
      in_specs=in_specs,
      out_specs=pl.BlockSpec((mq, e), lambda b, l: (b, 0)),
      compiler_params=pltpu.CompilerParams(
          dimension_semantics=("parallel", "arbitrary"),
          vmem_limit_bytes=vmem_limit),
  )(x0, enc, *stacked_inputs)

  # ---- kernel 2: vocab projection (lane-dense, vocab tiled) -------------------
  mtot = n_pad * lq
  tm = _pick_tile(mtot)
  tv = _pick_tile(vpad)

  logits = pl.pallas_call(
      _vocab_proj_kernel,
      out_shape=jax.ShapeDtypeStruct((mtot, vpad), f32),
      grid=(mtot // tm, vpad // tv),
      in_specs=[pl.BlockSpec((tm, e), lambda i, j: (i, 0)),
                pl.BlockSpec((e, tv), lambda i, j: (0, j)),
                pl.BlockSpec((1, tv), lambda i, j: (0, j))],
      out_specs=pl.BlockSpec((tm, tv), lambda i, j: (i, j)),
      compiler_params=pltpu.CompilerParams(
          dimension_semantics=("parallel", "parallel")),
  )(hidden, fc_w, fc_b)

  return logits.reshape(n_pad, lq, vpad)[:n, :, :vocab]


# =============================================================================
# Parameter init (deterministic) — mirrors the PyTorch module's parameters
# =============================================================================

def init_params(key, vocab, embed, num_layers, heads, fexp, max_len):
  d = embed // heads

  def rn(k, shape, scale=0.05):
    return jax.random.normal(k, shape, jnp.float32) * scale

  keys = jax.random.split(key, 4 + num_layers)
  params = {
      "word_emb": rn(keys[0], (vocab, embed), 0.5),
      "pos_emb": rn(keys[1], (max_len, embed), 0.5),
      "fc_w": rn(keys[2], (embed, vocab)),
      "fc_b": rn(keys[3], (1, vocab)),
      "layers": [],
  }
  for i in range(num_layers):
    lk = jax.random.split(keys[4 + i], 14)
    params["layers"].append({
        # DecoderBlock.attention (self-attention); per-head weights shared
        "sa_wq": rn(lk[0], (d, d)), "sa_wk": rn(lk[1], (d, d)),
        "sa_wv": rn(lk[2], (d, d)),
        "sa_wo": rn(lk[3], (embed, embed)), "sa_bo": rn(lk[4], (1, embed)),
        # DecoderBlock.norm
        "n0_g": jnp.ones((1, embed), jnp.float32),
        "n0_b": jnp.zeros((1, embed), jnp.float32),
        # TransformerBlock.attention (cross-attention)
        "ca_wq": rn(lk[5], (d, d)), "ca_wk": rn(lk[6], (d, d)),
        "ca_wv": rn(lk[7], (d, d)),
        "ca_wo": rn(lk[8], (embed, embed)), "ca_bo": rn(lk[9], (1, embed)),
        # TransformerBlock.norm1 / norm2
        "n1_g": jnp.ones((1, embed), jnp.float32),
        "n1_b": jnp.zeros((1, embed), jnp.float32),
        "n2_g": jnp.ones((1, embed), jnp.float32),
        "n2_b": jnp.zeros((1, embed), jnp.float32),
        # TransformerBlock.feed_forward
        "ff_w1": rn(lk[10], (embed, fexp * embed)),
        "ff_b1": rn(lk[11], (1, fexp * embed)),
        "ff_w2": rn(lk[12], (fexp * embed, embed)),
        "ff_b2": rn(lk[13], (1, embed)),
    })
  return params


# =============================================================================
# Pure-JAX reference (for correctness check)
# =============================================================================

def _ref_attention(q, k, v, wq, wk, wv, wo, bo, heads):
  n, lq, e = q.shape
  d = e // heads
  qh = q.reshape(n, lq, heads, d) @ wq
  kh = k.reshape(n, -1, heads, d) @ wk
  vh = v.reshape(n, -1, heads, d) @ wv
  energy = jnp.einsum("nqhd,nkhd->nhqk", qh, kh) / jnp.sqrt(jnp.float32(e))
  attn = jax.nn.softmax(energy, axis=-1)
  out = jnp.einsum("nhqk,nkhd->nqhd", attn, vh).reshape(n, lq, e)
  return out @ wo + bo


def _ref_ln(x, g, b, eps=1e-5):
  m = x.mean(-1, keepdims=True)
  v = ((x - m) ** 2).mean(-1, keepdims=True)
  return (x - m) / jnp.sqrt(v + eps) * g + b


def ref_decoder_forward(tokens, enc_out, params, heads):
  n, l = tokens.shape
  x = params["word_emb"][tokens] + params["pos_emb"][jnp.arange(l)][None, :, :]
  for lp in params["layers"]:
    sa = _ref_attention(x, x, x, lp["sa_wq"], lp["sa_wk"], lp["sa_wv"],
                        lp["sa_wo"], lp["sa_bo"], heads)
    query = _ref_ln(sa + x, lp["n0_g"], lp["n0_b"])
    ca = _ref_attention(query, enc_out, enc_out, lp["ca_wq"], lp["ca_wk"],
                        lp["ca_wv"], lp["ca_wo"], lp["ca_bo"], heads)
    h1 = _ref_ln(ca + query, lp["n1_g"], lp["n1_b"])
    ff = jnp.maximum(h1 @ lp["ff_w1"] + lp["ff_b1"], 0.0) @ lp["ff_w2"] + lp["ff_b2"]
    x = _ref_ln(ff + h1, lp["n2_g"], lp["n2_b"])
  return x @ params["fc_w"] + params["fc_b"]


# =============================================================================
# main
# =============================================================================

if __name__ == "__main__":
  N = 2
  TRG_LEN = 8
  SRC_LEN = 8
  EMBED = 32
  HEADS = 4
  NUM_LAYERS = 2
  FWD_EXP = 2
  VOCAB = 50
  MAX_LEN = 16

  key = jax.random.PRNGKey(0)
  k_tok, k_enc, k_par = jax.random.split(key, 3)

  tokens = jax.random.randint(k_tok, (N, TRG_LEN), 0, VOCAB, dtype=jnp.int32)
  enc_out = jax.random.normal(k_enc, (N, SRC_LEN, EMBED), jnp.float32)
  # masks exist in the PyTorch signature but are never used by the forward
  src_mask = jnp.ones((N, 1, 1, SRC_LEN), jnp.float32)
  trg_mask = jnp.tril(jnp.ones((TRG_LEN, TRG_LEN), jnp.float32))[None, None]

  params = init_params(k_par, VOCAB, EMBED, NUM_LAYERS, HEADS, FWD_EXP, MAX_LEN)

  fwd = jax.jit(functools.partial(decoder_forward, heads=HEADS))
  out = jax.block_until_ready(fwd(tokens, enc_out, src_mask, trg_mask, params))

  ref = jax.block_until_ready(ref_decoder_forward(tokens, enc_out, params, HEADS))

  assert out.shape == (N, TRG_LEN, VOCAB), out.shape
  np.testing.assert_allclose(np.asarray(out), np.asarray(ref), rtol=2e-2, atol=2e-2)

  print("KERNEL_OK")
</pallas_src>

<mosaic_0001>
module attributes {stable_mosaic.version = 11 : i64} {
  func.func @_decoder_stack_kernel(%arg0: i32, %arg1: i32, %arg2: memref<16x32xf32, #tpu.memory_space<vmem>>, %arg3: memref<16x32xbf16, #tpu.memory_space<vmem>>, %arg4: memref<1x32x32xbf16, #tpu.memory_space<vmem>>, %arg5: memref<1x32x32xbf16, #tpu.memory_space<vmem>>, %arg6: memref<1x32x32xbf16, #tpu.memory_space<vmem>>, %arg7: memref<1x4x8x32xbf16, #tpu.memory_space<vmem>>, %arg8: memref<1x1x32xf32, #tpu.memory_space<vmem>>, %arg9: memref<1x1x32xf32, #tpu.memory_space<vmem>>, %arg10: memref<1x1x32xf32, #tpu.memory_space<vmem>>, %arg11: memref<1x32x32xbf16, #tpu.memory_space<vmem>>, %arg12: memref<1x32x32xbf16, #tpu.memory_space<vmem>>, %arg13: memref<1x32x32xbf16, #tpu.memory_space<vmem>>, %arg14: memref<1x4x8x32xbf16, #tpu.memory_space<vmem>>, %arg15: memref<1x1x32xf32, #tpu.memory_space<vmem>>, %arg16: memref<1x1x32xf32, #tpu.memory_space<vmem>>, %arg17: memref<1x1x32xf32, #tpu.memory_space<vmem>>, %arg18: memref<1x32x64xbf16, #tpu.memory_space<vmem>>, %arg19: memref<1x1x64xf32, #tpu.memory_space<vmem>>, %arg20: memref<1x64x32xbf16, #tpu.memory_space<vmem>>, %arg21: memref<1x1x32xf32, #tpu.memory_space<vmem>>, %arg22: memref<1x1x32xf32, #tpu.memory_space<vmem>>, %arg23: memref<1x1x32xf32, #tpu.memory_space<vmem>>, %arg24: memref<16x32xf32, #tpu.memory_space<vmem>>) attributes {dimension_semantics = [#tpu.dimension_semantics<parallel>, #tpu.dimension_semantics<arbitrary>], iteration_bounds = array<i64: 1, 2>, scalar_prefetch = 0 : i64, scratch_operands = 0 : i64, tpu.core_type = #tpu.core_type<tc>, window_params = [{transform_indices = @transform_0, window_bounds = array<i64: 16, 32>}, {transform_indices = @transform_1, window_bounds = array<i64: 16, 32>}, {transform_indices = @transform_2, window_bounds = array<i64: 1, 32, 32>}, {transform_indices = @transform_3, window_bounds = array<i64: 1, 32, 32>}, {transform_indices = @transform_4, window_bounds = array<i64: 1, 32, 32>}, {transform_indices = @transform_5, window_bounds = array<i64: 1, 4, 8, 32>}, {transform_indices = @transform_6, window_bounds = array<i64: 1, 1, 32>}, {transform_indices = @transform_7, window_bounds = array<i64: 1, 1, 32>}, {transform_indices = @transform_8, window_bounds = array<i64: 1, 1, 32>}, {transform_indices = @transform_9, window_bounds = array<i64: 1, 32, 32>}, {transform_indices = @transform_10, window_bounds = array<i64: 1, 32, 32>}, {transform_indices = @transform_11, window_bounds = array<i64: 1, 32, 32>}, {transform_indices = @transform_12, window_bounds = array<i64: 1, 4, 8, 32>}, {transform_indices = @transform_13, window_bounds = array<i64: 1, 1, 32>}, {transform_indices = @transform_14, window_bounds = array<i64: 1, 1, 32>}, {transform_indices = @transform_15, window_bounds = array<i64: 1, 1, 32>}, {transform_indices = @transform_16, window_bounds = array<i64: 1, 32, 64>}, {transform_indices = @transform_17, window_bounds = array<i64: 1, 1, 64>}, {transform_indices = @transform_18, window_bounds = array<i64: 1, 64, 32>}, {transform_indices = @transform_19, window_bounds = array<i64: 1, 1, 32>}, {transform_indices = @transform_20, window_bounds = array<i64: 1, 1, 32>}, {transform_indices = @transform_21, window_bounds = array<i64: 1, 1, 32>}, {transform_indices = @transform_22, window_bounds = array<i64: 16, 32>}]} {
    %c0_i32 = arith.constant 0 : i32
    %0 = arith.cmpi eq, %arg1, %c0_i32 : i32
    %1 = arith.extui %0 : i1 to i32
    %c0_i32_0 = arith.constant 0 : i32
    %2 = arith.cmpi ne, %1, %c0_i32_0 : i32
    scf.if %2 {
      %c0_154 = arith.constant 0 : index
      %c0_155 = arith.constant 0 : index
      %295 = vector.load %arg2[%c0_154, %c0_155] : memref<16x32xf32, #tpu.memory_space<vmem>>, vector<16x32xf32>
      %c0_156 = arith.constant 0 : index
      %c0_157 = arith.constant 0 : index
      %296 = vector.load %arg24[%c0_156, %c0_157] : memref<16x32xf32, #tpu.memory_space<vmem>>, vector<16x32xf32>
      tpu.vector_store %arg24[%c0_156, %c0_157], %295 {strides = array<i32>} : memref<16x32xf32, #tpu.memory_space<vmem>>, vector<16x32xf32>,
    } else {
    }
    %c0 = arith.constant 0 : index
    %c0_1 = arith.constant 0 : index
    %3 = vector.load %arg24[%c0, %c0_1] : memref<16x32xf32, #tpu.memory_space<vmem>>, vector<16x32xf32>
    %c0_2 = arith.constant 0 : index
    %c0_3 = arith.constant 0 : index
    %4 = vector.load %arg3[%c0_2, %c0_3] : memref<16x32xbf16, #tpu.memory_space<vmem>>, vector<16x32xbf16>
    %5 = arith.truncf %3 : vector<16x32xf32> to vector<16x32xbf16>
    %c0_4 = arith.constant 0 : index
    %c0_5 = arith.constant 0 : index
    %c0_6 = arith.constant 0 : index
    %6 = vector.load %arg4[%c0_4, %c0_5, %c0_6] : memref<1x32x32xbf16, #tpu.memory_space<vmem>>, vector<1x32x32xbf16>
    %7 = vector.shape_cast %6 : vector<1x32x32xbf16> to vector<32x32xbf16>
    %cst = arith.constant dense<0.000000e+00> : vector<16x32xf32>
    %8 = tpu.matmul %5, %7, %cst {dimension_numbers = #tpu.dot_dimension_numbers<[1], [0], [0], [1], [0, 0, 1, 1], [], []>} : vector<16x32xbf16>, vector<32x32xbf16>, vector<16x32xf32> -> vector<16x32xf32>
    %c0_7 = arith.constant 0 : index
    %c0_8 = arith.constant 0 : index
    %c0_9 = arith.constant 0 : index
    %9 = vector.load %arg5[%c0_7, %c0_8, %c0_9] : memref<1x32x32xbf16, #tpu.memory_space<vmem>>, vector<1x32x32xbf16>
    %10 = vector.shape_cast %9 : vector<1x32x32xbf16> to vector<32x32xbf16>
    %cst_10 = arith.constant dense<0.000000e+00> : vector<16x32xf32>
    %11 = tpu.matmul %5, %10, %cst_10 {dimension_numbers = #tpu.dot_dimension_numbers<[1], [0], [0], [1], [0, 0, 1, 1], [], []>} : vector<16x32xbf16>, vector<32x32xbf16>, vector<16x32xf32> -> vector<16x32xf32>
    %c0_11 = arith.constant 0 : index
    %c0_12 = arith.constant 0 : index
    %c0_13 = arith.constant 0 : index
    %12 = vector.load %arg6[%c0_11, %c0_12, %c0_13] : memref<1x32x32xbf16, #tpu.memory_space<vmem>>, vector<1x32x32xbf16>
    %13 = vector.shape_cast %12 : vector<1x32x32xbf16> to vector<32x32xbf16>
    %cst_14 = arith.constant dense<0.000000e+00> : vector<16x32xf32>
    %14 = tpu.matmul %5, %13, %cst_14 {dimension_numbers = #tpu.dot_dimension_numbers<[1], [0], [0], [1], [0, 0, 1, 1], [], []>} : vector<16x32xbf16>, vector<32x32xbf16>, vector<16x32xf32> -> vector<16x32xf32>
    %cst_15 = arith.constant 0.000000e+00 : f32
    %15 = vector.broadcast %cst_15 : f32 to vector<16x32xf32>
    %16 = vector.extract_strided_slice %8 {offsets = [0, 0], sizes = [16, 8], strides = [1, 1]} : vector<16x32xf32> to vector<16x8xf32>
    %17 = vector.extract_strided_slice %11 {offsets = [0, 0], sizes = [16, 8], strides = [1, 1]} : vector<16x32xf32> to vector<16x8xf32>
    %cst_16 = arith.constant dense<0.000000e+00> : vector<16x16xf32>
    %18 = tpu.matmul %16, %17, %cst_16 {dimension_numbers = #tpu.dot_dimension_numbers<[1], [1], [0], [0], [0, 0, 1, 0], [], []>} : vector<16x8xf32>, vector<16x8xf32>, vector<16x16xf32> -> vector<16x16xf32>
    %cst_17 = arith.constant dense<0xFF800000> : vector<16xf32>
    %19 = vector.multi_reduction <maximumf>, %18, %cst_17 [1] : vector<16x16xf32> to vector<16xf32>
    %20 = vector.shape_cast %19 : vector<16xf32> to vector<16x1xf32>
    %21 = vector.broadcast %20 : vector<16x1xf32> to vector<16x16xf32>
    %22 = arith.subf %18, %21 : vector<16x16xf32>
    %23 = math.exp %22 : vector<16x16xf32>
    %cst_18 = arith.constant dense<0.000000e+00> : vector<16xf32>
    %24 = vector.multi_reduction <add>, %23, %cst_18 [1] : vector<16x16xf32> to vector<16xf32>
    %25 = vector.shape_cast %24 : vector<16xf32> to vector<16x1xf32>
    %26 = tpu.reciprocal %25 {approx = true} : vector<16x1xf32> -> vector<16x1xf32>
    %27 = vector.broadcast %26 : vector<16x1xf32> to vector<16x16xf32>
    %28 = arith.mulf %23, %27 : vector<16x16xf32>
    %29 = vector.extract_strided_slice %14 {offsets = [0, 0], sizes = [16, 8], strides = [1, 1]} : vector<16x32xf32> to vector<16x8xf32>
    %cst_19 = arith.constant dense<0.000000e+00> : vector<16x8xf32>
    %30 = tpu.matmul %28, %29, %cst_19 {dimension_numbers = #tpu.dot_dimension_numbers<[1], [0], [0], [1], [0, 0, 1, 1], [], []>} : vector<16x16xf32>, vector<16x8xf32>, vector<16x8xf32> -> vector<16x8xf32>
    %31 = arith.truncf %30 : vector<16x8xf32> to vector<16x8xbf16>
    %c0_20 = arith.constant 0 : index
    %c0_21 = arith.constant 0 : index
    %c0_22 = arith.constant 0 : index
    %c0_23 = arith.constant 0 : index
    %32 = vector.load %arg7[%c0_20, %c0_21, %c0_22, %c0_23] : memref<1x4x8x32xbf16, #tpu.memory_space<vmem>>, vector<1x1x8x32xbf16>
    %33 = vector.shape_cast %32 : vector<1x1x8x32xbf16> to vector<8x32xbf16>
    %cst_24 = arith.constant dense<0.000000e+00> : vector<16x32xf32>
    %34 = tpu.matmul %31, %33, %cst_24 {dimension_numbers = #tpu.dot_dimension_numbers<[1], [0], [0], [1], [0, 0, 1, 1], [], []>} : vector<16x8xbf16>, vector<8x32xbf16>, vector<16x32xf32> -> vector<16x32xf32>
    %35 = arith.addf %15, %34 : vector<16x32xf32>
    %36 = vector.extract_strided_slice %8 {offsets = [0, 8], sizes = [16, 8], strides = [1, 1]} : vector<16x32xf32> to vector<16x8xf32>
    %37 = vector.extract_strided_slice %11 {offsets = [0, 8], sizes = [16, 8], strides = [1, 1]} : vector<16x32xf32> to vector<16x8xf32>
    %cst_25 = arith.constant dense<0.000000e+00> : vector<16x16xf32>
    %38 = tpu.matmul %36, %37, %cst_25 {dimension_numbers = #tpu.dot_dimension_numbers<[1], [1], [0], [0], [0, 0, 1, 0], [], []>} : vector<16x8xf32>, vector<16x8xf32>, vector<16x16xf32> -> vector<16x16xf32>
    %cst_26 = arith.constant dense<0xFF800000> : vector<16xf32>
    %39 = vector.multi_reduction <maximumf>, %38, %cst_26 [1] : vector<16x16xf32> to vector<16xf32>
    %40 = vector.shape_cast %39 : vector<16xf32> to vector<16x1xf32>
    %41 = vector.broadcast %40 : vector<16x1xf32> to vector<16x16xf32>
    %42 = arith.subf %38, %41 : vector<16x16xf32>
    %43 = math.exp %42 : vector<16x16xf32>
    %cst_27 = arith.constant dense<0.000000e+00> : vector<16xf32>
    %44 = vector.multi_reduction <add>, %43, %cst_27 [1] : vector<16x16xf32> to vector<16xf32>
    %45 = vector.shape_cast %44 : vector<16xf32> to vector<16x1xf32>
    %46 = tpu.reciprocal %45 {approx = true} : vector<16x1xf32> -> vector<16x1xf32>
    %47 = vector.broadcast %46 : vector<16x1xf32> to vector<16x16xf32>
    %48 = arith.mulf %43, %47 : vector<16x16xf32>
    %49 = vector.extract_strided_slice %14 {offsets = [0, 8], sizes = [16, 8], strides = [1, 1]} : vector<16x32xf32> to vector<16x8xf32>
    %cst_28 = arith.constant dense<0.000000e+00> : vector<16x8xf32>
    %50 = tpu.matmul %48, %49, %cst_28 {dimension_numbers = #tpu.dot_dimension_numbers<[1], [0], [0], [1], [0, 0, 1, 1], [], []>} : vector<16x16xf32>, vector<16x8xf32>, vector<16x8xf32> -> vector<16x8xf32>
    %51 = arith.truncf %50 : vector<16x8xf32> to vector<16x8xbf16>
    %c0_29 = arith.constant 0 : index
    %c1 = arith.constant 1 : index
    %c0_30 = arith.constant 0 : index
    %c0_31 = arith.constant 0 : index
    %52 = vector.load %arg7[%c0_29, %c1, %c0_30, %c0_31] : memref<1x4x8x32xbf16, #tpu.memory_space<vmem>>, vector<1x1x8x32xbf16>
    %53 = vector.shape_cast %52 : vector<1x1x8x32xbf16> to vector<8x32xbf16>
    %cst_32 = arith.constant dense<0.000000e+00> : vector<16x32xf32>
    %54 = tpu.matmul %51, %53, %cst_32 {dimension_numbers = #tpu.dot_dimension_numbers<[1], [0], [0], [1], [0, 0, 1, 1], [], []>} : vector<16x8xbf16>, vector<8x32xbf16>, vector<16x32xf32> -> vector<16x32xf32>
    %55 = arith.addf %35, %54 : vector<16x32xf32>
    %56 = vector.extract_strided_slice %8 {offsets = [0, 16], sizes = [16, 8], strides = [1, 1]} : vector<16x32xf32> to vector<16x8xf32>
    %57 = vector.extract_strided_slice %11 {offsets = [0, 16], sizes = [16, 8], strides = [1, 1]} : vector<16x32xf32> to vector<16x8xf32>
    %cst_33 = arith.constant dense<0.000000e+00> : vector<16x16xf32>
    %58 = tpu.matmul %56, %57, %cst_33 {dimension_numbers = #tpu.dot_dimension_numbers<[1], [1], [0], [0], [0, 0, 1, 0], [], []>} : vector<16x8xf32>, vector<16x8xf32>, vector<16x16xf32> -> vector<16x16xf32>
    %cst_34 = arith.constant dense<0xFF800000> : vector<16xf32>
    %59 = vector.multi_reduction <maximumf>, %58, %cst_34 [1] : vector<16x16xf32> to vector<16xf32>
    %60 = vector.shape_cast %59 : vector<16xf32> to vector<16x1xf32>
    %61 = vector.broadcast %60 : vector<16x1xf32> to vector<16x16xf32>
    %62 = arith.subf %58, %61 : vector<16x16xf32>
    %63 = math.exp %62 : vector<16x16xf32>
    %cst_35 = arith.constant dense<0.000000e+00> : vector<16xf32>
    %64 = vector.multi_reduction <add>, %63, %cst_35 [1] : vector<16x16xf32> to vector<16xf32>
    %65 = vector.shape_cast %64 : vector<16xf32> to vector<16x1xf32>
    %66 = tpu.reciprocal %65 {approx = true} : vector<16x1xf32> -> vector<16x1xf32>
    %67 = vector.broadcast %66 : vector<16x1xf32> to vector<16x16xf32>
    %68 = arith.mulf %63, %67 : vector<16x16xf32>
    %69 = vector.extract_strided_slice %14 {offsets = [0, 16], sizes = [16, 8], strides = [1, 1]} : vector<16x32xf32> to vector<16x8xf32>
    %cst_36 = arith.constant dense<0.000000e+00> : vector<16x8xf32>
    %70 = tpu.matmul %68, %69, %cst_36 {dimension_numbers = #tpu.dot_dimension_numbers<[1], [0], [0], [1], [0, 0, 1, 1], [], []>} : vector<16x16xf32>, vector<16x8xf32>, vector<16x8xf32> -> vector<16x8xf32>
    %71 = arith.truncf %70 : vector<16x8xf32> to vector<16x8xbf16>
    %c0_37 = arith.constant 0 : index
    %c2 = arith.constant 2 : index
    %c0_38 = arith.constant 0 : index
    %c0_39 = arith.constant 0 : index
    %72 = vector.load %arg7[%c0_37, %c2, %c0_38, %c0_39] : memref<1x4x8x32xbf16, #tpu.memory_space<vmem>>, vector<1x1x8x32xbf16>
    %73 = vector.shape_cast %72 : vector<1x1x8x32xbf16> to vector<8x32xbf16>
    %cst_40 = arith.constant dense<0.000000e+00> : vector<16x32xf32>
    %74 = tpu.matmul %71, %73, %cst_40 {dimension_numbers = #tpu.dot_dimension_numbers<[1], [0], [0], [1], [0, 0, 1, 1], [], []>} : vector<16x8xbf16>, vector<8x32xbf16>, vector<16x32xf32> -> vector<16x32xf32>
    %75 = arith.addf %55, %74 : vector<16x32xf32>
    %76 = vector.extract_strided_slice %8 {offsets = [0, 24], sizes = [16, 8], strides = [1, 1]} : vector<16x32xf32> to vector<16x8xf32>
    %77 = vector.extract_strided_slice %11 {offsets = [0, 24], sizes = [16, 8], strides = [1, 1]} : vector<16x32xf32> to vector<16x8xf32>
    %cst_41 = arith.constant dense<0.000000e+00> : vector<16x16xf32>
    %78 = tpu.matmul %76, %77, %cst_41 {dimension_numbers = #tpu.dot_dimension_numbers<[1], [1], [0], [0], [0, 0, 1, 0], [], []>} : vector<16x8xf32>, vector<16x8xf32>, vector<16x16xf32> -> vector<16x16xf32>
    %cst_42 = arith.constant dense<0xFF800000> : vector<16xf32>
    %79 = vector.multi_reduction <maximumf>, %78, %cst_42 [1] : vector<16x16xf32> to vector<16xf32>
    %80 = vector.shape_cast %79 : vector<16xf32> to vector<16x1xf32>
    %81 = vector.broadcast %80 : vector<16x1xf32> to vector<16x16xf32>
    %82 = arith.subf %78, %81 : vector<16x16xf32>
    %83 = math.exp %82 : vector<16x16xf32>
    %cst_43 = arith.constant dense<0.000000e+00> : vector<16xf32>
    %84 = vector.multi_reduction <add>, %83, %cst_43 [1] : vector<16x16xf32> to vector<16xf32>
    %85 = vector.shape_cast %84 : vector<16xf32> to vector<16x1xf32>
    %86 = tpu.reciprocal %85 {approx = true} : vector<16x1xf32> -> vector<16x1xf32>
    %87 = vector.broadcast %86 : vector<16x1xf32> to vector<16x16xf32>
    %88 = arith.mulf %83, %87 : vector<16x16xf32>
    %89 = vector.extract_strided_slice %14 {offsets = [0, 24], sizes = [16, 8], strides = [1, 1]} : vector<16x32xf32> to vector<16x8xf32>
    %cst_44 = arith.constant dense<0.000000e+00> : vector<16x8xf32>
    %90 = tpu.matmul %88, %89, %cst_44 {dimension_numbers = #tpu.dot_dimension_numbers<[1], [0], [0], [1], [0, 0, 1, 1], [], []>} : vector<16x16xf32>, vector<16x8xf32>, vector<16x8xf32> -> vector<16x8xf32>
    %91 = arith.truncf %90 : vector<16x8xf32> to vector<16x8xbf16>
    %c0_45 = arith.constant 0 : index
    %c3 = arith.constant 3 : index
    %c0_46 = arith.constant 0 : index
    %c0_47 = arith.constant 0 : index
    %92 = vector.load %arg7[%c0_45, %c3, %c0_46, %c0_47] : memref<1x4x8x32xbf16, #tpu.memory_space<vmem>>, vector<1x1x8x32xbf16>
    %93 = vector.shape_cast %92 : vector<1x1x8x32xbf16> to vector<8x32xbf16>
    %cst_48 = arith.constant dense<0.000000e+00> : vector<16x32xf32>
    %94 = tpu.matmul %91, %93, %cst_48 {dimension_numbers = #tpu.dot_dimension_numbers<[1], [0], [0], [1], [0, 0, 1, 1], [], []>} : vector<16x8xbf16>, vector<8x32xbf16>, vector<16x32xf32> -> vector<16x32xf32>
    %95 = arith.addf %75, %94 : vector<16x32xf32>
    %c0_49 = arith.constant 0 : index
    %c0_50 = arith.constant 0 : index
    %c0_51 = arith.constant 0 : index
    %96 = vector.load %arg8[%c0_49, %c0_50, %c0_51] : memref<1x1x32xf32, #tpu.memory_space<vmem>>, vector<1x1x32xf32>
    %97 = vector.shape_cast %96 : vector<1x1x32xf32> to vector<1x32xf32>
    %98 = vector.broadcast %97 : vector<1x32xf32> to vector<16x32xf32>
    %99 = arith.addf %95, %98 : vector<16x32xf32>
    %100 = arith.addf %99, %3 : vector<16x32xf32>
    %cst_52 = arith.constant dense<0.000000e+00> : vector<16xf32>
    %101 = vector.multi_reduction <add>, %100, %cst_52 [1] : vector<16x32xf32> to vector<16xf32>
    %102 = vector.shape_cast %101 : vector<16xf32> to vector<16x1xf32>
    %cst_53 = arith.constant 3.200000e+01 : f32
    %103 = vector.broadcast %cst_53 : f32 to vector<16x1xf32>
    %104 = arith.divf %102, %103 : vector<16x1xf32>
    %105 = vector.broadcast %104 : vector<16x1xf32> to vector<16x32xf32>
    %106 = arith.subf %100, %105 : vector<16x32xf32>
    %107 = arith.mulf %106, %106 : vector<16x32xf32>
    %cst_54 = arith.constant dense<0.000000e+00> : vector<16xf32>
    %108 = vector.multi_reduction <add>, %107, %cst_54 [1] : vector<16x32xf32> to vector<16xf32>
    %109 = vector.shape_cast %108 : vector<16xf32> to vector<16x1xf32>
    %cst_55 = arith.constant 3.200000e+01 : f32
    %110 = vector.broadcast %cst_55 : f32 to vector<16x1xf32>
    %111 = arith.divf %109, %110 : vector<16x1xf32>
    %112 = vector.broadcast %104 : vector<16x1xf32> to vector<16x32xf32>
    %113 = arith.subf %100, %112 : vector<16x32xf32>
    %cst_56 = arith.constant 9.99999974E-6 : f32
    %114 = vector.broadcast %cst_56 : f32 to vector<16x1xf32>
    %115 = arith.addf %111, %114 : vector<16x1xf32>
    %116 = math.rsqrt %115 : vector<16x1xf32>
    %117 = vector.broadcast %116 : vector<16x1xf32> to vector<16x32xf32>
    %118 = arith.mulf %113, %117 : vector<16x32xf32>
    %c0_57 = arith.constant 0 : index
    %c0_58 = arith.constant 0 : index
    %c0_59 = arith.constant 0 : index
    %119 = vector.load %arg9[%c0_57, %c0_58, %c0_59] : memref<1x1x32xf32, #tpu.memory_space<vmem>>, vector<1x1x32xf32>
    %120 = vector.shape_cast %119 : vector<1x1x32xf32> to vector<1x32xf32>
    %121 = vector.broadcast %120 : vector<1x32xf32> to vector<16x32xf32>
    %122 = arith.mulf %118, %121 : vector<16x32xf32>
    %c0_60 = arith.constant 0 : index
    %c0_61 = arith.constant 0 : index
    %c0_62 = arith.constant 0 : index
    %123 = vector.load %arg10[%c0_60, %c0_61, %c0_62] : memref<1x1x32xf32, #tpu.memory_space<vmem>>, vector<1x1x32xf32>
    %124 = vector.shape_cast %123 : vector<1x1x32xf32> to vector<1x32xf32>
    %125 = vector.broadcast %124 : vector<1x32xf32> to vector<16x32xf32>
    %126 = arith.addf %122, %125 : vector<16x32xf32>
    %127 = arith.truncf %126 : vector<16x32xf32> to vector<16x32xbf16>
    %c0_63 = arith.constant 0 : index
    %c0_64 = arith.constant 0 : index
    %c0_65 = arith.constant 0 : index
    %128 = vector.load %arg11[%c0_63, %c0_64, %c0_65] : memref<1x32x32xbf16, #tpu.memory_space<vmem>>, vector<1x32x32xbf16>
    %129 = vector.shape_cast %128 : vector<1x32x32xbf16> to vector<32x32xbf16>
    %cst_66 = arith.constant dense<0.000000e+00> : vector<16x32xf32>
    %130 = tpu.matmul %127, %129, %cst_66 {dimension_numbers = #tpu.dot_dimension_numbers<[1], [0], [0], [1], [0, 0, 1, 1], [], []>} : vector<16x32xbf16>, vector<32x32xbf16>, vector<16x32xf32> -> vector<16x32xf32>
    %c0_67 = arith.constant 0 : index
    %c0_68 = arith.constant 0 : index
    %c0_69 = arith.constant 0 : index
    %131 = vector.load %arg12[%c0_67, %c0_68, %c0_69] : memref<1x32x32xbf16, #tpu.memory_space<vmem>>, vector<1x32x32xbf16>
    %132 = vector.shape_cast %131 : vector<1x32x32xbf16> to vector<32x32xbf16>
    %cst_70 = arith.constant dense<0.000000e+00> : vector<16x32xf32>
    %133 = tpu.matmul %4, %132, %cst_70 {dimension_numbers = #tpu.dot_dimension_numbers<[1], [0], [0], [1], [0, 0, 1, 1], [], []>} : vector<16x32xbf16>, vector<32x32xbf16>, vector<16x32xf32> -> vector<16x32xf32>
    %c0_71 = arith.constant 0 : index
    %c0_72 = arith.constant 0 : index
    %c0_73 = arith.constant 0 : index
    %134 = vector.load %arg13[%c0_71, %c0_72, %c0_73] : memref<1x32x32xbf16, #tpu.memory_space<vmem>>, vector<1x32x32xbf16>
    %135 = vector.shape_cast %134 : vector<1x32x32xbf16> to vector<32x32xbf16>
    %cst_74 = arith.constant dense<0.000000e+00> : vector<16x32xf32>
    %136 = tpu.matmul %4, %135, %cst_74 {dimension_numbers = #tpu.dot_dimension_numbers<[1], [0], [0], [1], [0, 0, 1, 1], [], []>} : vector<16x32xbf16>, vector<32x32xbf16>, vector<16x32xf32> -> vector<16x32xf32>
    %cst_75 = arith.constant 0.000000e+00 : f32
    %137 = vector.broadcast %cst_75 : f32 to vector<16x32xf32>
    %138 = vector.extract_strided_slice %130 {offsets = [0, 0], sizes = [16, 8], strides = [1, 1]} : vector<16x32xf32> to vector<16x8xf32>
    %139 = vector.extract_strided_slice %133 {offsets = [0, 0], sizes = [16, 8], strides = [1, 1]} : vector<16x32xf32> to vector<16x8xf32>
    %cst_76 = arith.constant dense<0.000000e+00> : vector<16x16xf32>
    %140 = tpu.matmul %138, %139, %cst_76 {dimension_numbers = #tpu.dot_dimension_numbers<[1], [1], [0], [0], [0, 0, 1, 0], [], []>} : vector<16x8xf32>, vector<16x8xf32>, vector<16x16xf32> -> vector<16x16xf32>
    %cst_77 = arith.constant dense<0xFF800000> : vector<16xf32>
    %141 = vector.multi_reduction <maximumf>, %140, %cst_77 [1] : vector<16x16xf32> to vector<16xf32>
    %142 = vector.shape_cast %141 : vector<16xf32> to vector<16x1xf32>
    %143 = vector.broadcast %142 : vector<16x1xf32> to vector<16x16xf32>
    %144 = arith.subf %140, %143 : vector<16x16xf32>
    %145 = math.exp %144 : vector<16x16xf32>
    %cst_78 = arith.constant dense<0.000000e+00> : vector<16xf32>
    %146 = vector.multi_reduction <add>, %145, %cst_78 [1] : vector<16x16xf32> to vector<16xf32>
    %147 = vector.shape_cast %146 : vector<16xf32> to vector<16x1xf32>
    %148 = tpu.reciprocal %147 {approx = true} : vector<16x1xf32> -> vector<16x1xf32>
    %149 = vector.broadcast %148 : vector<16x1xf32> to vector<16x16xf32>
    %150 = arith.mulf %145, %149 : vector<16x16xf32>
    %151 = vector.extract_strided_slice %136 {offsets = [0, 0], sizes = [16, 8], strides = [1, 1]} : vector<16x32xf32> to vector<16x8xf32>
    %cst_79 = arith.constant dense<0.000000e+00> : vector<16x8xf32>
    %152 = tpu.matmul %150, %151, %cst_79 {dimension_numbers = #tpu.dot_dimension_numbers<[1], [0], [0], [1], [0, 0, 1, 1], [], []>} : vector<16x16xf32>, vector<16x8xf32>, vector<16x8xf32> -> vector<16x8xf32>
    %153 = arith.truncf %152 : vector<16x8xf32> to vector<16x8xbf16>
    %c0_80 = arith.constant 0 : index
    %c0_81 = arith.constant 0 : index
    %c0_82 = arith.constant 0 : index
    %c0_83 = arith.constant 0 : index
    %154 = vector.load %arg14[%c0_80, %c0_81, %c0_82, %c0_83] : memref<1x4x8x32xbf16, #tpu.memory_space<vmem>>, vector<1x1x8x32xbf16>
    %155 = vector.shape_cast %154 : vector<1x1x8x32xbf16> to vector<8x32xbf16>
    %cst_84 = arith.constant dense<0.000000e+00> : vector<16x32xf32>
    %156 = tpu.matmul %153, %155, %cst_84 {dimension_numbers = #tpu.dot_dimension_numbers<[1], [0], [0], [1], [0, 0, 1, 1], [], []>} : vector<16x8xbf16>, vector<8x32xbf16>, vector<16x32xf32> -> vector<16x32xf32>
    %157 = arith.addf %137, %156 : vector<16x32xf32>
    %158 = vector.extract_strided_slice %130 {offsets = [0, 8], sizes = [16, 8], strides = [1, 1]} : vector<16x32xf32> to vector<16x8xf32>
    %159 = vector.extract_strided_slice %133 {offsets = [0, 8], sizes = [16, 8], strides = [1, 1]} : vector<16x32xf32> to vector<16x8xf32>
    %cst_85 = arith.constant dense<0.000000e+00> : vector<16x16xf32>
    %160 = tpu.matmul %158, %159, %cst_85 {dimension_numbers = #tpu.dot_dimension_numbers<[1], [1], [0], [0], [0, 0, 1, 0], [], []>} : vector<16x8xf32>, vector<16x8xf32>, vector<16x16xf32> -> vector<16x16xf32>
    %cst_86 = arith.constant dense<0xFF800000> : vector<16xf32>
    %161 = vector.multi_reduction <maximumf>, %160, %cst_86 [1] : vector<16x16xf32> to vector<16xf32>
    %162 = vector.shape_cast %161 : vector<16xf32> to vector<16x1xf32>
    %163 = vector.broadcast %162 : vector<16x1xf32> to vector<16x16xf32>
    %164 = arith.subf %160, %163 : vector<16x16xf32>
    %165 = math.exp %164 : vector<16x16xf32>
    %cst_87 = arith.constant dense<0.000000e+00> : vector<16xf32>
    %166 = vector.multi_reduction <add>, %165, %cst_87 [1] : vector<16x16xf32> to vector<16xf32>
    %167 = vector.shape_cast %166 : vector<16xf32> to vector<16x1xf32>
    %168 = tpu.reciprocal %167 {approx = true} : vector<16x1xf32> -> vector<16x1xf32>
    %169 = vector.broadcast %168 : vector<16x1xf32> to vector<16x16xf32>
    %170 = arith.mulf %165, %169 : vector<16x16xf32>
    %171 = vector.extract_strided_slice %136 {offsets = [0, 8], sizes = [16, 8], strides = [1, 1]} : vector<16x32xf32> to vector<16x8xf32>
    %cst_88 = arith.constant dense<0.000000e+00> : vector<16x8xf32>
    %172 = tpu.matmul %170, %171, %cst_88 {dimension_numbers = #tpu.dot_dimension_numbers<[1], [0], [0], [1], [0, 0, 1, 1], [], []>} : vector<16x16xf32>, vector<16x8xf32>, vector<16x8xf32> -> vector<16x8xf32>
    %173 = arith.truncf %172 : vector<16x8xf32> to vector<16x8xbf16>
    %c0_89 = arith.constant 0 : index
    %c1_90 = arith.constant 1 : index
    %c0_91 = arith.constant 0 : index
    %c0_92 = arith.constant 0 : index
    %174 = vector.load %arg14[%c0_89, %c1_90, %c0_91, %c0_92] : memref<1x4x8x32xbf16, #tpu.memory_space<vmem>>, vector<1x1x8x32xbf16>
    %175 = vector.shape_cast %174 : vector<1x1x8x32xbf16> to vector<8x32xbf16>
    %cst_93 = arith.constant dense<0.000000e+00> : vector<16x32xf32>
    %176 = tpu.matmul %173, %175, %cst_93 {dimension_numbers = #tpu.dot_dimension_numbers<[1], [0], [0], [1], [0, 0, 1, 1], [], []>} : vector<16x8xbf16>, vector<8x32xbf16>, vector<16x32xf32> -> vector<16x32xf32>
    %177 = arith.addf %157, %176 : vector<16x32xf32>
    %178 = vector.extract_strided_slice %130 {offsets = [0, 16], sizes = [16, 8], strides = [1, 1]} : vector<16x32xf32> to vector<16x8xf32>
    %179 = vector.extract_strided_slice %133 {offsets = [0, 16], sizes = [16, 8], strides = [1, 1]} : vector<16x32xf32> to vector<16x8xf32>
    %cst_94 = arith.constant dense<0.000000e+00> : vector<16x16xf32>
    %180 = tpu.matmul %178, %179, %cst_94 {dimension_numbers = #tpu.dot_dimension_numbers<[1], [1], [0], [0], [0, 0, 1, 0], [], []>} : vector<16x8xf32>, vector<16x8xf32>, vector<16x16xf32> -> vector<16x16xf32>
    %cst_95 = arith.constant dense<0xFF800000> : vector<16xf32>
    %181 = vector.multi_reduction <maximumf>, %180, %cst_95 [1] : vector<16x16xf32> to vector<16xf32>
    %182 = vector.shape_cast %181 : vector<16xf32> to vector<16x1xf32>
    %183 = vector.broadcast %182 : vector<16x1xf32> to vector<16x16xf32>
    %184 = arith.subf %180, %183 : vector<16x16xf32>
    %185 = math.exp %184 : vector<16x16xf32>
    %cst_96 = arith.constant dense<0.000000e+00> : vector<16xf32>
    %186 = vector.multi_reduction <add>, %185, %cst_96 [1] : vector<16x16xf32> to vector<16xf32>
    %187 = vector.shape_cast %186 : vector<16xf32> to vector<16x1xf32>
    %188 = tpu.reciprocal %187 {approx = true} : vector<16x1xf32> -> vector<16x1xf32>
    %189 = vector.broadcast %188 : vector<16x1xf32> to vector<16x16xf32>
    %190 = arith.mulf %185, %189 : vector<16x16xf32>
    %191 = vector.extract_strided_slice %136 {offsets = [0, 16], sizes = [16, 8], strides = [1, 1]} : vector<16x32xf32> to vector<16x8xf32>
    %cst_97 = arith.constant dense<0.000000e+00> : vector<16x8xf32>
    %192 = tpu.matmul %190, %191, %cst_97 {dimension_numbers = #tpu.dot_dimension_numbers<[1], [0], [0], [1], [0, 0, 1, 1], [], []>} : vector<16x16xf32>, vector<16x8xf32>, vector<16x8xf32> -> vector<16x8xf32>
    %193 = arith.truncf %192 : vector<16x8xf32> to vector<16x8xbf16>
    %c0_98 = arith.constant 0 : index
    %c2_99 = arith.constant 2 : index
    %c0_100 = arith.constant 0 : index
    %c0_101 = arith.constant 0 : index
    %194 = vector.load %arg14[%c0_98, %c2_99, %c0_100, %c0_101] : memref<1x4x8x32xbf16, #tpu.memory_space<vmem>>, vector<1x1x8x32xbf16>
    %195 = vector.shape_cast %194 : vector<1x1x8x32xbf16> to vector<8x32xbf16>
    %cst_102 = arith.constant dense<0.000000e+00> : vector<16x32xf32>
    %196 = tpu.matmul %193, %195, %cst_102 {dimension_numbers = #tpu.dot_dimension_numbers<[1], [0], [0], [1], [0, 0, 1, 1], [], []>} : vector<16x8xbf16>, vector<8x32xbf16>, vector<16x32xf32> -> vector<16x32xf32>
    %197 = arith.addf %177, %196 : vector<16x32xf32>
    %198 = vector.extract_strided_slice %130 {offsets = [0, 24], sizes = [16, 8], strides = [1, 1]} : vector<16x32xf32> to vector<16x8xf32>
    %199 = vector.extract_strided_slice %133 {offsets = [0, 24], sizes = [16, 8], strides = [1, 1]} : vector<16x32xf32> to vector<16x8xf32>
    %cst_103 = arith.constant dense<0.000000e+00> : vector<16x16xf32>
    %200 = tpu.matmul %198, %199, %cst_103 {dimension_numbers = #tpu.dot_dimension_numbers<[1], [1], [0], [0], [0, 0, 1, 0], [], []>} : vector<16x8xf32>, vector<16x8xf32>, vector<16x16xf32> -> vector<16x16xf32>
    %cst_104 = arith.constant dense<0xFF800000> : vector<16xf32>
    %201 = vector.multi_reduction <maximumf>, %200, %cst_104 [1] : vector<16x16xf32> to vector<16xf32>
    %202 = vector.shape_cast %201 : vector<16xf32> to vector<16x1xf32>
    %203 = vector.broadcast %202 : vector<16x1xf32> to vector<16x16xf32>
    %204 = arith.subf %200, %203 : vector<16x16xf32>
    %205 = math.exp %204 : vector<16x16xf32>
    %cst_105 = arith.constant dense<0.000000e+00> : vector<16xf32>
    %206 = vector.multi_reduction <add>, %205, %cst_105 [1] : vector<16x16xf32> to vector<16xf32>
    %207 = vector.shape_cast %206 : vector<16xf32> to vector<16x1xf32>
    %208 = tpu.reciprocal %207 {approx = true} : vector<16x1xf32> -> vector<16x1xf32>
    %209 = vector.broadcast %208 : vector<16x1xf32> to vector<16x16xf32>
    %210 = arith.mulf %205, %209 : vector<16x16xf32>
    %211 = vector.extract_strided_slice %136 {offsets = [0, 24], sizes = [16, 8], strides = [1, 1]} : vector<16x32xf32> to vector<16x8xf32>
    %cst_106 = arith.constant dense<0.000000e+00> : vector<16x8xf32>
    %212 = tpu.matmul %210, %211, %cst_106 {dimension_numbers = #tpu.dot_dimension_numbers<[1], [0], [0], [1], [0, 0, 1, 1], [], []>} : vector<16x16xf32>, vector<16x8xf32>, vector<16x8xf32> -> vector<16x8xf32>
    %213 = arith.truncf %212 : vector<16x8xf32> to vector<16x8xbf16>
    %c0_107 = arith.constant 0 : index
    %c3_108 = arith.constant 3 : index
    %c0_109 = arith.constant 0 : index
    %c0_110 = arith.constant 0 : index
    %214 = vector.load %arg14[%c0_107, %c3_108, %c0_109, %c0_110] : memref<1x4x8x32xbf16, #tpu.memory_space<vmem>>, vector<1x1x8x32xbf16>
    %215 = vector.shape_cast %214 : vector<1x1x8x32xbf16> to vector<8x32xbf16>
    %cst_111 = arith.constant dense<0.000000e+00> : vector<16x32xf32>
    %216 = tpu.matmul %213, %215, %cst_111 {dimension_numbers = #tpu.dot_dimension_numbers<[1], [0], [0], [1], [0, 0, 1, 1], [], []>} : vector<16x8xbf16>, vector<8x32xbf16>, vector<16x32xf32> -> vector<16x32xf32>
    %217 = arith.addf %197, %216 : vector<16x32xf32>
    %c0_112 = arith.constant 0 : index
    %c0_113 = arith.constant 0 : index
    %c0_114 = arith.constant 0 : index
    %218 = vector.load %arg15[%c0_112, %c0_113, %c0_114] : memref<1x1x32xf32, #tpu.memory_space<vmem>>, vector<1x1x32xf32>
    %219 = vector.shape_cast %218 : vector<1x1x32xf32> to vector<1x32xf32>
    %220 = vector.broadcast %219 : vector<1x32xf32> to vector<16x32xf32>
    %221 = arith.addf %217, %220 : vector<16x32xf32>
    %222 = arith.addf %221, %126 : vector<16x32xf32>
    %cst_115 = arith.constant dense<0.000000e+00> : vector<16xf32>
    %223 = vector.multi_reduction <add>, %222, %cst_115 [1] : vector<16x32xf32> to vector<16xf32>
    %224 = vector.shape_cast %223 : vector<16xf32> to vector<16x1xf32>
    %cst_116 = arith.constant 3.200000e+01 : f32
    %225 = vector.broadcast %cst_116 : f32 to vector<16x1xf32>
    %226 = arith.divf %224, %225 : vector<16x1xf32>
    %227 = vector.broadcast %226 : vector<16x1xf32> to vector<16x32xf32>
    %228 = arith.subf %222, %227 : vector<16x32xf32>
    %229 = arith.mulf %228, %228 : vector<16x32xf32>
    %cst_117 = arith.constant dense<0.000000e+00> : vector<16xf32>
    %230 = vector.multi_reduction <add>, %229, %cst_117 [1] : vector<16x32xf32> to vector<16xf32>
    %231 = vector.shape_cast %230 : vector<16xf32> to vector<16x1xf32>
    %cst_118 = arith.constant 3.200000e+01 : f32
    %232 = vector.broadcast %cst_118 : f32 to vector<16x1xf32>
    %233 = arith.divf %231, %232 : vector<16x1xf32>
    %234 = vector.broadcast %226 : vector<16x1xf32> to vector<16x32xf32>
    %235 = arith.subf %222, %234 : vector<16x32xf32>
    %cst_119 = arith.constant 9.99999974E-6 : f32
    %236 = vector.broadcast %cst_119 : f32 to vector<16x1xf32>
    %237 = arith.addf %233, %236 : vector<16x1xf32>
    %238 = math.rsqrt %237 : vector<16x1xf32>
    %239 = vector.broadcast %238 : vector<16x1xf32> to vector<16x32xf32>
    %240 = arith.mulf %235, %239 : vector<16x32xf32>
    %c0_120 = arith.constant 0 : index
    %c0_121 = arith.constant 0 : index
    %c0_122 = arith.constant 0 : index
    %241 = vector.load %arg16[%c0_120, %c0_121, %c0_122] : memref<1x1x32xf32, #tpu.memory_space<vmem>>, vector<1x1x32xf32>
    %242 = vector.shape_cast %241 : vector<1x1x32xf32> to vector<1x32xf32>
    %243 = vector.broadcast %242 : vector<1x32xf32> to vector<16x32xf32>
    %244 = arith.mulf %240, %243 : vector<16x32xf32>
    %c0_123 = arith.constant 0 : index
    %c0_124 = arith.constant 0 : index
    %c0_125 = arith.constant 0 : index
    %245 = vector.load %arg17[%c0_123, %c0_124, %c0_125] : memref<1x1x32xf32, #tpu.memory_space<vmem>>, vector<1x1x32xf32>
    %246 = vector.shape_cast %245 : vector<1x1x32xf32> to vector<1x32xf32>
    %247 = vector.broadcast %246 : vector<1x32xf32> to vector<16x32xf32>
    %248 = arith.addf %244, %247 : vector<16x32xf32>
    %249 = arith.truncf %248 : vector<16x32xf32> to vector<16x32xbf16>
    %c0_126 = arith.constant 0 : index
    %c0_127 = arith.constant 0 : index
    %c0_128 = arith.constant 0 : index
    %250 = vector.load %arg18[%c0_126, %c0_127, %c0_128] : memref<1x32x64xbf16, #tpu.memory_space<vmem>>, vector<1x32x64xbf16>
    %251 = vector.shape_cast %250 : vector<1x32x64xbf16> to vector<32x64xbf16>
    %cst_129 = arith.constant dense<0.000000e+00> : vector<16x64xf32>
    %252 = tpu.matmul %249, %251, %cst_129 {dimension_numbers = #tpu.dot_dimension_numbers<[1], [0], [0], [1], [0, 0, 1, 1], [], []>} : vector<16x32xbf16>, vector<32x64xbf16>, vector<16x64xf32> -> vector<16x64xf32>
    %c0_130 = arith.constant 0 : index
    %c0_131 = arith.constant 0 : index
    %c0_132 = arith.constant 0 : index
    %253 = vector.load %arg19[%c0_130, %c0_131, %c0_132] : memref<1x1x64xf32, #tpu.memory_space<vmem>>, vector<1x1x64xf32>
    %254 = vector.shape_cast %253 : vector<1x1x64xf32> to vector<1x64xf32>
    %255 = vector.broadcast %254 : vector<1x64xf32> to vector<16x64xf32>
    %256 = arith.addf %252, %255 : vector<16x64xf32>
    %cst_133 = arith.constant 0.000000e+00 : f32
    %257 = vector.broadcast %cst_133 : f32 to vector<16x64xf32>
    %258 = arith.maximumf %256, %257 : vector<16x64xf32>
    %259 = arith.truncf %258 : vector<16x64xf32> to vector<16x64xbf16>
    %c0_134 = arith.constant 0 : index
    %c0_135 = arith.constant 0 : index
    %c0_136 = arith.constant 0 : index
    %260 = vector.load %arg20[%c0_134, %c0_135, %c0_136] : memref<1x64x32xbf16, #tpu.memory_space<vmem>>, vector<1x64x32xbf16>
    %261 = vector.shape_cast %260 : vector<1x64x32xbf16> to vector<64x32xbf16>
    %cst_137 = arith.constant dense<0.000000e+00> : vector<16x32xf32>
    %262 = tpu.matmul %259, %261, %cst_137 {dimension_numbers = #tpu.dot_dimension_numbers<[1], [0], [0], [1], [0, 0, 1, 1], [], []>} : vector<16x64xbf16>, vector<64x32xbf16>, vector<16x32xf32> -> vector<16x32xf32>
    %c0_138 = arith.constant 0 : index
    %c0_139 = arith.constant 0 : index
    %c0_140 = arith.constant 0 : index
    %263 = vector.load %arg21[%c0_138, %c0_139, %c0_140] : memref<1x1x32xf32, #tpu.memory_space<vmem>>, vector<1x1x32xf32>
    %264 = vector.shape_cast %263 : vector<1x1x32xf32> to vector<1x32xf32>
    %265 = vector.broadcast %264 : vector<1x32xf32> to vector<16x32xf32>
    %266 = arith.addf %262, %265 : vector<16x32xf32>
    %267 = arith.addf %266, %248 : vector<16x32xf32>
    %cst_141 = arith.constant dense<0.000000e+00> : vector<16xf32>
    %268 = vector.multi_reduction <add>, %267, %cst_141 [1] : vector<16x32xf32> to vector<16xf32>
    %269 = vector.shape_cast %268 : vector<16xf32> to vector<16x1xf32>
    %cst_142 = arith.constant 3.200000e+01 : f32
    %270 = vector.broadcast %cst_142 : f32 to vector<16x1xf32>
    %271 = arith.divf %269, %270 : vector<16x1xf32>
    %272 = vector.broadcast %271 : vector<16x1xf32> to vector<16x32xf32>
    %273 = arith.subf %267, %272 : vector<16x32xf32>
    %274 = arith.mulf %273, %273 : vector<16x32xf32>
    %cst_143 = arith.constant dense<0.000000e+00> : vector<16xf32>
    %275 = vector.multi_reduction <add>, %274, %cst_143 [1] : vector<16x32xf32> to vector<16xf32>
    %276 = vector.shape_cast %275 : vector<16xf32> to vector<16x1xf32>
    %cst_144 = arith.constant 3.200000e+01 : f32
    %277 = vector.broadcast %cst_144 : f32 to vector<16x1xf32>
    %278 = arith.divf %276, %277 : vector<16x1xf32>
    %279 = vector.broadcast %271 : vector<16x1xf32> to vector<16x32xf32>
    %280 = arith.subf %267, %279 : vector<16x32xf32>
    %cst_145 = arith.constant 9.99999974E-6 : f32
    %281 = vector.broadcast %cst_145 : f32 to vector<16x1xf32>
    %282 = arith.addf %278, %281 : vector<16x1xf32>
    %283 = math.rsqrt %282 : vector<16x1xf32>
    %284 = vector.broadcast %283 : vector<16x1xf32> to vector<16x32xf32>
    %285 = arith.mulf %280, %284 : vector<16x32xf32>
    %c0_146 = arith.constant 0 : index
    %c0_147 = arith.constant 0 : index
    %c0_148 = arith.constant 0 : index
    %286 = vector.load %arg22[%c0_146, %c0_147, %c0_148] : memref<1x1x32xf32, #tpu.memory_space<vmem>>, vector<1x1x32xf32>
    %287 = vector.shape_cast %286 : vector<1x1x32xf32> to vector<1x32xf32>
    %288 = vector.broadcast %287 : vector<1x32xf32> to vector<16x32xf32>
    %289 = arith.mulf %285, %288 : vector<16x32xf32>
    %c0_149 = arith.constant 0 : index
    %c0_150 = arith.constant 0 : index
    %c0_151 = arith.constant 0 : index
    %290 = vector.load %arg23[%c0_149, %c0_150, %c0_151] : memref<1x1x32xf32, #tpu.memory_space<vmem>>, vector<1x1x32xf32>
    %291 = vector.shape_cast %290 : vector<1x1x32xf32> to vector<1x32xf32>
    %292 = vector.broadcast %291 : vector<1x32xf32> to vector<16x32xf32>
    %293 = arith.addf %289, %292 : vector<16x32xf32>
    %c0_152 = arith.constant 0 : index
    %c0_153 = arith.constant 0 : index
    %294 = vector.load %arg24[%c0_152, %c0_153] : memref<16x32xf32, #tpu.memory_space<vmem>>, vector<16x32xf32>
    tpu.vector_store %arg24[%c0_152, %c0_153], %293 {strides = array<i32>} : memref<16x32xf32, #tpu.memory_space<vmem>>, vector<16x32xf32>,
    return
  }
  func.func @transform_0(%arg0: i32, %arg1: i32) -> (i32, i32) {
    %c0_i32 = arith.constant 0 : i32
    %c0_i32_0 = arith.constant 0 : i32
    return %arg0, %c0_i32 : i32, i32
  }
  func.func @transform_1(%arg0: i32, %arg1: i32) -> (i32, i32) {
    %c0_i32 = arith.constant 0 : i32
    %c0_i32_0 = arith.constant 0 : i32
    return %arg0, %c0_i32 : i32, i32
  }
  func.func @transform_2(%arg0: i32, %arg1: i32) -> (i32, i32, i32) {
    %c0_i32 = arith.constant 0 : i32
    %c0_i32_0 = arith.constant 0 : i32
    %c0_i32_1 = arith.constant 0 : i32
    return %arg1, %c0_i32, %c0_i32_0 : i32, i32, i32
  }
  func.func @transform_3(%arg0: i32, %arg1: i32) -> (i32, i32, i32) {
    %c0_i32 = arith.constant 0 : i32
    %c0_i32_0 = arith.constant 0 : i32
    %c0_i32_1 = arith.constant 0 : i32
    return %arg1, %c0_i32, %c0_i32_0 : i32, i32, i32
  }
  func.func @transform_4(%arg0: i32, %arg1: i32) -> (i32, i32, i32) {
    %c0_i32 = arith.constant 0 : i32
    %c0_i32_0 = arith.constant 0 : i32
    %c0_i32_1 = arith.constant 0 : i32
    return %arg1, %c0_i32, %c0_i32_0 : i32, i32, i32
  }
  func.func @transform_5(%arg0: i32, %arg1: i32) -> (i32, i32, i32, i32) {
    %c0_i32 = arith.constant 0 : i32
    %c0_i32_0 = arith.constant 0 : i32
    %c0_i32_1 = arith.constant 0 : i32
    %c0_i32_2 = arith.constant 0 : i32
    return %arg1, %c0_i32, %c0_i32_0, %c0_i32_1 : i32, i32, i32, i32
  }
  func.func @transform_6(%arg0: i32, %arg1: i32) -> (i32, i32, i32) {
    %c0_i32 = arith.constant 0 : i32
    %c0_i32_0 = arith.constant 0 : i32
    %c0_i32_1 = arith.constant 0 : i32
    return %arg1, %c0_i32, %c0_i32_0 : i32, i32, i32
  }
  func.func @transform_7(%arg0: i32, %arg1: i32) -> (i32, i32, i32) {
    %c0_i32 = arith.constant 0 : i32
    %c0_i32_0 = arith.constant 0 : i32
    %c0_i32_1 = arith.constant 0 : i32
    return %arg1, %c0_i32, %c0_i32_0 : i32, i32, i32
  }
  func.func @transform_8(%arg0: i32, %arg1: i32) -> (i32, i32, i32) {
    %c0_i32 = arith.constant 0 : i32
    %c0_i32_0 = arith.constant 0 : i32
    %c0_i32_1 = arith.constant 0 : i32
    return %arg1, %c0_i32, %c0_i32_0 : i32, i32, i32
  }
  func.func @transform_9(%arg0: i32, %arg1: i32) -> (i32, i32, i32) {
    %c0_i32 = arith.constant 0 : i32
    %c0_i32_0 = arith.constant 0 : i32
    %c0_i32_1 = arith.constant 0 : i32
    return %arg1, %c0_i32, %c0_i32_0 : i32, i32, i32
  }
  func.func @transform_10(%arg0: i32, %arg1: i32) -> (i32, i32, i32) {
    %c0_i32 = arith.constant 0 : i32
    %c0_i32_0 = arith.constant 0 : i32
    %c0_i32_1 = arith.constant 0 : i32
    return %arg1, %c0_i32, %c0_i32_0 : i32, i32, i32
  }
  func.func @transform_11(%arg0: i32, %arg1: i32) -> (i32, i32, i32) {
    %c0_i32 = arith.constant 0 : i32
    %c0_i32_0 = arith.constant 0 : i32
    %c0_i32_1 = arith.constant 0 : i32
    return %arg1, %c0_i32, %c0_i32_0 : i32, i32, i32
  }
  func.func @transform_12(%arg0: i32, %arg1: i32) -> (i32, i32, i32, i32) {
    %c0_i32 = arith.constant 0 : i32
    %c0_i32_0 = arith.constant 0 : i32
    %c0_i32_1 = arith.constant 0 : i32
    %c0_i32_2 = arith.constant 0 : i32
    return %arg1, %c0_i32, %c0_i32_0, %c0_i32_1 : i32, i32, i32, i32
  }
  func.func @transform_13(%arg0: i32, %arg1: i32) -> (i32, i32, i32) {
    %c0_i32 = arith.constant 0 : i32
    %c0_i32_0 = arith.constant 0 : i32
    %c0_i32_1 = arith.constant 0 : i32
    return %arg1, %c0_i32, %c0_i32_0 : i32, i32, i32
  }
  func.func @transform_14(%arg0: i32, %arg1: i32) -> (i32, i32, i32) {
    %c0_i32 = arith.constant 0 : i32
    %c0_i32_0 = arith.constant 0 : i32
    %c0_i32_1 = arith.constant 0 : i32
    return %arg1, %c0_i32, %c0_i32_0 : i32, i32, i32
  }
  func.func @transform_15(%arg0: i32, %arg1: i32) -> (i32, i32, i32) {
    %c0_i32 = arith.constant 0 : i32
    %c0_i32_0 = arith.constant 0 : i32
    %c0_i32_1 = arith.constant 0 : i32
    return %arg1, %c0_i32, %c0_i32_0 : i32, i32, i32
  }
  func.func @transform_16(%arg0: i32, %arg1: i32) -> (i32, i32, i32) {
    %c0_i32 = arith.constant 0 : i32
    %c0_i32_0 = arith.constant 0 : i32
    %c0_i32_1 = arith.constant 0 : i32
    return %arg1, %c0_i32, %c0_i32_0 : i32, i32, i32
  }
  func.func @transform_17(%arg0: i32, %arg1: i32) -> (i32, i32, i32) {
    %c0_i32 = arith.constant 0 : i32
    %c0_i32_0 = arith.constant 0 : i32
    %c0_i32_1 = arith.constant 0 : i32
    return %arg1, %c0_i32, %c0_i32_0 : i32, i32, i32
  }
  func.func @transform_18(%arg0: i32, %arg1: i32) -> (i32, i32, i32) {
    %c0_i32 = arith.constant 0 : i32
    %c0_i32_0 = arith.constant 0 : i32
    %c0_i32_1 = arith.constant 0 : i32
    return %arg1, %c0_i32, %c0_i32_0 : i32, i32, i32
  }
  func.func @transform_19(%arg0: i32, %arg1: i32) -> (i32, i32, i32) {
    %c0_i32 = arith.constant 0 : i32
    %c0_i32_0 = arith.constant 0 : i32
    %c0_i32_1 = arith.constant 0 : i32
    return %arg1, %c0_i32, %c0_i32_0 : i32, i32, i32
  }
  func.func @transform_20(%arg0: i32, %arg1: i32) -> (i32, i32, i32) {
    %c0_i32 = arith.constant 0 : i32
    %c0_i32_0 = arith.constant 0 : i32
    %c0_i32_1 = arith.constant 0 : i32
    return %arg1, %c0_i32, %c0_i32_0 : i32, i32, i32
  }
  func.func @transform_21(%arg0: i32, %arg1: i32) -> (i32, i32, i32) {
    %c0_i32 = arith.constant 0 : i32
    %c0_i32_0 = arith.constant 0 : i32
    %c0_i32_1 = arith.constant 0 : i32
    return %arg1, %c0_i32, %c0_i32_0 : i32, i32, i32
  }
  func.func @transform_22(%arg0: i32, %arg1: i32) -> (i32, i32) {
    %c0_i32 = arith.constant 0 : i32
    %c0_i32_0 = arith.constant 0 : i32
    return %arg0, %c0_i32 : i32, i32
  }
}

module attributes {stable_mosaic.version = 11 : i64} {
  func.func @_vocab_proj_kernel(%arg0: i32, %arg1: i32, %arg2: memref<16x32xf32, #tpu.memory_space<vmem>>, %arg3: memref<32x128xbf16, #tpu.memory_space<vmem>>, %arg4: memref<1x128xf32, #tpu.memory_space<vmem>>, %arg5: memref<16x128xf32, #tpu.memory_space<vmem>>) attributes {dimension_semantics = [#tpu.dimension_semantics<parallel>, #tpu.dimension_semantics<parallel>], iteration_bounds = array<i64: 1, 1>, scalar_prefetch = 0 : i64, scratch_operands = 0 : i64, tpu.core_type = #tpu.core_type<tc>, window_params = [{transform_indices = @transform_0, window_bounds = array<i64: 16, 32>}, {transform_indices = @transform_1, window_bounds = array<i64: 32, 128>}, {transform_indices = @transform_2, window_bounds = array<i64: 1, 128>}, {transform_indices = @transform_3, window_bounds = array<i64: 16, 128>}]} {
    %c0 = arith.constant 0 : index
    %c0_0 = arith.constant 0 : index
    %0 = vector.load %arg2[%c0, %c0_0] : memref<16x32xf32, #tpu.memory_space<vmem>>, vector<16x32xf32>
    %1 = arith.truncf %0 : vector<16x32xf32> to vector<16x32xbf16>
    %c0_1 = arith.constant 0 : index
    %c0_2 = arith.constant 0 : index
    %2 = vector.load %arg3[%c0_1, %c0_2] : memref<32x128xbf16, #tpu.memory_space<vmem>>, vector<32x128xbf16>
    %cst = arith.constant dense<0.000000e+00> : vector<16x128xf32>
    %3 = tpu.matmul %1, %2, %cst {dimension_numbers = #tpu.dot_dimension_numbers<[1], [0], [0], [1], [0, 0, 1, 1], [], []>} : vector<16x32xbf16>, vector<32x128xbf16>, vector<16x128xf32> -> vector<16x128xf32>
    %c0_3 = arith.constant 0 : index
    %c0_4 = arith.constant 0 : index
    %4 = vector.load %arg4[%c0_3, %c0_4] : memref<1x128xf32, #tpu.memory_space<vmem>>, vector<1x128xf32>
    %5 = vector.broadcast %4 : vector<1x128xf32> to vector<16x128xf32>
    %6 = arith.addf %3, %5 : vector<16x128xf32>
    %c0_5 = arith.constant 0 : index
    %c0_6 = arith.constant 0 : index
    %7 = vector.load %arg5[%c0_5, %c0_6] : memref<16x128xf32, #tpu.memory_space<vmem>>, vector<16x128xf32>
    tpu.vector_store %arg5[%c0_5, %c0_6], %6 {strides = array<i32>} : memref<16x128xf32, #tpu.memory_space<vmem>>, vector<16x128xf32>,
    return
  }
  func.func @transform_0(%arg0: i32, %arg1: i32) -> (i32, i32) {
    %c0_i32 = arith.constant 0 : i32
    %c0_i32_0 = arith.constant 0 : i32
    return %arg0, %c0_i32 : i32, i32
  }
  func.func @transform_1(%arg0: i32, %arg1: i32) -> (i32, i32) {
    %c0_i32 = arith.constant 0 : i32
    %c0_i32_0 = arith.constant 0 : i32
    return %c0_i32, %arg1 : i32, i32
  }
  func.func @transform_2(%arg0: i32, %arg1: i32) -> (i32, i32) {
    %c0_i32 = arith.constant 0 : i32
    %c0_i32_0 = arith.constant 0 : i32
    return %c0_i32, %arg1 : i32, i32
  }
  func.func @transform_3(%arg0: i32, %arg1: i32) -> (i32, i32) {
    %c0_i32 = arith.constant 0 : i32
    return %arg0, %arg1 : i32, i32
  }
}

</mosaic_0001>

<bundles_post_ra>
// kernel: decoder_forward.3
= control target key start
LH: loop header
LB: loop body
LE: loop exit
PB: predicated region body
PF: predicated region fallthrough
CT: control target
= control target key end

     0   :  { %v151_v1 = vmov 0.0   ;;  %vm152_vm0 = vmmov 0   ;;  %s203_s0 = inlined_call_operand.vmem [shape: f32[16,32], index: 0, kind: input, shape index: {}]   ;;  %s204_s1 = inlined_call_operand.vmem [shape: bf16[32,128], index: 1, kind: input, shape index: {}]   ;;  %s205_s2 = inlined_call_operand.vmem [shape: f32[1,128], index: 2, kind: input, shape index: {}]   ;;  %s206_s3 = inlined_call_operand.hbm [shape: f32[16,128], index: 3, kind: output, shape index: {}]  }
   0x1   :  { %v125_v0 = vld [vmem:[%s204_s1] sm:$0xff]   ;;  %112 = vmatprep.subr.bf16.mxu0 %v151_v1  ;;  %v126_v2 = vld [vmem:[%s204_s1 + $0x8] sm:$0xff]   ;;  %116 = vmatprep.mubr.msk.bf16.mxu0 %vm152_vm0, %v151_v1 }
   0x2   :  { %113 = vmatpush3.bf16.msra.mxu0 %v125_v0  ;;  %v16_v3 = vld [vmem:[%s203_s0] sm:$0xff]  ;;  %v17_v4 = vld [vmem:[%s203_s0 + $0x8] sm:$0xff] }
   0x3   :  { %114 = vmatprep.subr.bf16.mxu0 %v151_v1 }
   0x4   :  { %8 = vsyncpa [#allocation3], 0  ;;  %v18_v5 = vpack.c.bf16 %v17_v4, %v16_v3  ;;  %vm42_vm1 = vcmask 261120   ;;  %v105_v6 = vld [vmem:[%s205_s2] ss:$0 sm:$0xff]  ;;  %s153_s1 = smov [#allocation2]  }
   0x5   :  { %s94_s22 = sshll.u32 %s153_s1, 4  ;;  %s95_s22 = int_to_ptr.vmem [resolvable:$true] %s94_s22 }
   0x6   :  { %115 = vmatpush3.bf16.msra.mxu0 %v126_v2  ;;  %s127_s0 = scalar_lea.vmem %s95_s22, 256  ;;  %p132_p1 = scmp.lt.s32.totalorder %s95_s22, %s95_s22 }
   0x7   :  { %p128_p0 = scmp.ne.s32.totalorder %s95_s22, %s127_s0  ;;  %p133_p2 = scmp.lt.s32.totalorder %s127_s0, %s127_s0 }
   0x9   :  { %117 = vmatmul.mubr.msk.bf16.vlgmr.msra.gmra.mrb[0].mxu0 %vm42_vm1, %v18_v5  ;;  %p134_p3 = por %p133_p2, %p132_p1 }
   0xb   :  { %p135_p4 = pnand %p134_p3, %p128_p0 }
  0xdc   :  { %v80_v7 = vpop.f32.mrb[0].mxu0 }
  0xdd   :  { %v81_v8 = vadd.f32 %v105_v6, %v80_v7  ;;  %v118_v9 = vpop.f32.mrb[1].mxu0 }
  0xde   :  { %v83_v10 = vpop.f32.mrb[2].mxu0 }
  0xdf   :  { %87 = vst [vmem:[#allocation2] sm:$0xff] %v81_v8  ;;  %v84_v11 = vadd.f32 %v105_v6, %v83_v10  ;;  %v119_v12 = vpop.f32.mrb[3].mxu0 }
  0xe1   :  { %88 = vst [vmem:[#allocation2 + $0x8] sm:$0xff] %v84_v11 }
  0xe2   :  { %138 = shalt.err (!%p135_p4)
}
  0xe3   :  { %s139_s24 = scalar_lea.hbm %s206_s3, 256 }
  0xe4   :  { %p140_p5 = scmp.ne.s32.totalorder %s206_s3, %s139_s24  ;;  %p143_p6 = scmp.lt.u32.totalorder %s139_s24, %s206_s3 }
  0xe6   :  { %p145_p7 = pnand %p143_p6, %p140_p5 }
  0xe8   :  { %148 = shalt.err (!%p145_p7)
}
  0xe9   :  { %s154_s29 = smov 128   ;;  %s155_s30 = smov 8  }
  0xea   :  { %100 = dma.vmem_to_hbm [thread:$0]  %s95_s22, 256, %s206_s3, [#allocation3], %s154_s29, %s154_s29, %s155_s30  }
  0xeb   :  { %149 = dma.done.wait [#allocation3], 256  }
  0xec   :  { %150 = vsyncadd [#allocation3], 4294967040 }
  0xed   :  { %104 = vsyncpa [#allocation3], 1 }

// kernel: decoder_forward.2
= control target key start
LH: loop header
LB: loop body
LE: loop exit
PB: predicated region body
PF: predicated region fallthrough
CT: control target
= control target key end

     0   :  { %s4915_s28 = smov 0   ;;  %s4917_s29 = smov 0   ;;  %s5433_s0 = inlined_call_operand.vmem [shape: f32[16,32], index: 0, kind: input, shape index: {}]   ;;  %s5434_s1 = inlined_call_operand.vmem [shape: bf16[16,32], index: 1, kind: input, shape index: {}]   ;;  %s5435_s2 = inlined_call_operand.vmem [shape: bf16[2,32,32], index: 2, kind: input, shape index: {}]   ;;  %s5436_s3 = inlined_call_operand.vmem [shape: bf16[2,32,32], index: 3, kind: input, shape index: {}]   ;;  %s5437_s4 = inlined_call_operand.vmem [shape: bf16[2,32,32], index: 4, kind: input, shape index: {}]   ;;  %s5438_s5 = inlined_call_operand.vmem [shape: bf16[2,4,8,32], index: 5, kind: input, shape index: {}]   ;;  %s5439_s6 = inlined_call_operand.vmem [shape: f32[2,1,32], index: 6, kind: input, shape index: {}]   ;;  %s5440_s7 = inlined_call_operand.vmem [shape: f32[2,1,32], index: 7, kind: input, shape index: {}]   ;;  %s5441_s8 = inlined_call_operand.vmem [shape: f32[2,1,32], index: 8, kind: input, shape index: {}]   ;;  %s5442_s9 = inlined_call_operand.vmem [shape: bf16[2,32,32], index: 9, kind: input, shape index: {}]   ;;  %s5443_s10 = inlined_call_operand.vmem [shape: bf16[2,32,32], index: 10, kind: input, shape index: {}]   ;;  %s5444_s11 = inlined_call_operand.vmem [shape: bf16[2,32,32], index: 11, kind: input, shape index: {}]   ;;  %s5445_s12 = inlined_call_operand.vmem [shape: bf16[2,4,8,32], index: 12, kind: input, shape index: {}]   ;;  %s5446_s13 = inlined_call_operand.vmem [shape: f32[2,1,32], index: 13, kind: input, shape index: {}]   ;;  %s5447_s14 = inlined_call_operand.vmem [shape: f32[2,1,32], index: 14, kind: input, shape index: {}]   ;;  %s5448_s15 = inlined_call_operand.vmem [shape: f32[2,1,32], index: 15, kind: input, shape index: {}]   ;;  %s5449_s16 = inlined_call_operand.vmem [shape: bf16[2,32,64], index: 16, kind: input, shape index: {}]   ;;  %s5450_s17 = inlined_call_operand.vmem [shape: f32[2,1,64], index: 17, kind: input, shape index: {}]   ;;  %s5451_s18 = inlined_call_operand.vmem [shape: bf16[2,64,32], index: 18, kind: input, shape index: {}]   ;;  %s5452_s19 = inlined_call_operand.vmem [shape: f32[2,1,32], index: 19, kind: input, shape index: {}]   ;;  %s5453_s20 = inlined_call_operand.vmem [shape: f32[2,1,32], index: 20, kind: input, shape index: {}]   ;;  %s5454_s21 = inlined_call_operand.vmem [shape: f32[2,1,32], index: 21, kind: input, shape index: {}]   ;;  %s5455_s22 = inlined_call_operand.vmem [shape: f32[16,32], index: 22, kind: output, shape index: {}]  }
   0x1   :  { %5464 = sst [smem:[#allocation8_spill]] %s5433_s0 }
   0x2   :  { %5465 = sst [smem:[#allocation9_spill]] %s5434_s1 }
   0x3   :  { %5466 = sst [smem:[#allocation10_spill]] %s5435_s2 }
   0x4   :  { %5467 = sst [smem:[#allocation11_spill]] %s5436_s3  ;;  %s4913_s3 = smov 0  }
   0x5   :  { %5468 = sst [smem:[#allocation12_spill]] %s5437_s4 }
   0x6   :  { %5469 = sst [smem:[#allocation13_spill]] %s5438_s5 }
   0x7   :  { %5470 = sst [smem:[#allocation14_spill]] %s5439_s6 }
   0x8   :  { %5471 = sst [smem:[#allocation15_spill]] %s5441_s8 }
   0x9   :  { %5472 = sst [smem:[#allocation16_spill]] %s5442_s9 }
   0xa   :  { %5473 = sst [smem:[#allocation17_spill]] %s5443_s10 }
   0xb   :  { %5474 = sst [smem:[#allocation18_spill]] %s5444_s11 }
   0xc   :  { %5475 = sst [smem:[#allocation19_spill]] %s5445_s12 }
   0xd   :  { %5476 = sst [smem:[#allocation20_spill]] %s5447_s14 }
   0xe   :  { %5477 = sst [smem:[#allocation21_spill]] %s5448_s15 }
   0xf   :  { %5478 = sst [smem:[#allocation22_spill]] %s5449_s16 }
  0x10   :  { %5479 = sst [smem:[#allocation23_spill]] %s5451_s18 }
  0x11   :  { %5480 = sst [smem:[#allocation24_spill]] %s5452_s19 }
  0x12   :  { %5481 = sst [smem:[#allocation25_spill]] %s5453_s20 }
  0x13   :  { %5482 = sst [smem:[#allocation26_spill]] %s5454_s21 }
  0x14   :  { %5483 = sst [smem:[#allocation27_spill]] %s5455_s22 }
  0x15 LB: > { %5484 = sst [smem:[#allocation2_spill]] %s4783_s3  ;;  %s41_s30 = sadd.s32 1, %s4787_s28  ;;  %s4791_s29 = sphi %s4917_s29, %s32_s29   ;;  %s4787_s28 = sphi %s4915_s28, %s5533_s28   ;;  %s4783_s3 = sphi %s4913_s3, %s5532_s3  }
  0x16   : > { %5485 = sst [smem:[#allocation3_spill]] %s4787_s28  ;;  %p4036_p0 = scmp.ge.s32.totalorder %s4791_s29, 1 }
  0x17   : > { %5486 = sst [smem:[#allocation4_spill]] %s4791_s29  ;;  %p42_p1 = scmp.ge.s32.totalorder %s41_s30, 2 }
  0x18   : > { %p816_p2 = scmp.lt.s32.totalorder %s4791_s29, 3 }
  0x19   : > { %s5535_s30 = smov (%p42_p1, %s41_s30), 0 }
  0x1a   : > { %5487 = sst [smem:[#allocation5_spill]] %s5535_s30  ;;  %p817_p3 = pnand %p4036_p0, %p816_p2 }
  0x1c   : > { %820 = sbr.rel (%p817_p3) target bundleno = 6646 (0x19f6), region = 108 }
  0x23   : > { %p975_p4 = scmp.lt.s32.totalorder %s4783_s3, 1  ;;  %s5489_s26 = sld [smem:[#allocation10_spill]] }
  0x24   : > { %s5490_s28 = sld [smem:[#allocation11_spill]]  ;;  %s5491_s21 = sld [smem:[#allocation12_spill]] }
  0x25   : > { %s4935_s4 = scalar_select %p975_p4, %s4783_s3, 1 }
  0x26   : > { %s5493_s1 = sld [smem:[#allocation13_spill]]  ;;  %s5495_s9 = sld [smem:[#allocation16_spill]] }
  0x27   : > { %s4161_s0 = sshll.u32 %s4935_s4, 4  ;;  %s5496_s10 = sld [smem:[#allocation17_spill]] }
  0x28   : > { %s5497_s11 = sld [smem:[#allocation18_spill]]  ;;  %s5498_s12 = sld [smem:[#allocation19_spill]] }
  0x29   : > { %s4945_s2 = scalar_lea.vmem %s5489_s26, %s4161_s0  ;;  %s5502_s16 = sld [smem:[#allocation22_spill]] }
  0x2a   : > { %s984_s29 = scalar_lea.vmem %s5490_s28, %s4161_s0  ;;  %s4953_s20 = scalar_lea.vmem %s5491_s21, %s4161_s0 }
  0x2b   : > { %5492 = sst [smem:[#allocation6_spill]] %s4953_s20  ;;  %s5503_s18 = sld [smem:[#allocation23_spill]] }
  0x2c   : > { %s4958_s5 = scalar_lea.vmem %s5493_s1, %s4161_s0  ;;  %s4971_s21 = scalar_lea.vmem %s5495_s9, %s4161_s0 }
  0x2d   : > { %s4976_s19 = scalar_lea.vmem %s5496_s10, %s4161_s0  ;;  %s5504_s20 = sld [smem:[#allocation24_spill]] }
  0x2e   : > { %s4981_s6 = scalar_lea.vmem %s5497_s11, %s4161_s0  ;;  %s4986_s24 = scalar_lea.vmem %s5498_s12, %s4161_s0 }
  0x2f   : > { %5499 = sst [smem:[#allocation7_spill]] %s4986_s24  ;;  %s5003_s11 = scalar_lea.vmem %s5502_s16, %s4161_s0 }
  0x30   : > { %s4170_s24 = sshll.u32 %s4935_s4, 5  ;;  %s5505_s15 = sld [smem:[#allocation25_spill]] }
  0x31   : > { %s5013_s27 = scalar_lea.vmem %s5503_s18, %s4170_s24  ;;  %s5506_s16 = sld [smem:[#allocation26_spill]] }
  0x32   : > { %s5507_s26 = sld [smem:[#allocation2_spill]] }
  0x33   : > { %s1048_s10 = scalar_lea.vmem %s5504_s20, %s4935_s4 }
  0x36   : > { %s1051_s23 = scalar_lea.vmem %s5505_s15, %s4935_s4 }
  0x37   : > { %s1054_s14 = scalar_lea.vmem %s5506_s16, %s4935_s4 }
  0x38   : > { %p4057_p5 = scmp.ne.s32.totalorder %s5507_s26, 0 }
  0x39   : > { %s5508_s28 = sld [smem:[#allocation8_spill]] (!%p4057_p5)  ;;  %vm1068_vm0 = vcmask (!%p4057_p5), 261120   ;;  %s5510_s8 = sld [smem:[#allocation27_spill]] (!%p4057_p5) }
  0x3a   : > { %1065 = sbr.rel (%p4057_p5) target bundleno = 66 (0x42), region = 112 }
  0x3f   : > { %s5509_s30 = smov (!%p4057_p5), %s5508_s28  ;;  %v1066_v0 = vld [vmem:[%s5508_s28] sm:$0xff] (!%p4057_p5) }
  0x40   : > { %v1067_v1 = vld [vmem:[%s5509_s30 + $0x8] sm:$0xff] (!%p4057_p5)  ;;  %1069 = vst.msk [vmem:[%s5510_s8] sm:$0xff] (!%p4057_p5), %vm1068_vm0, %v1066_v0 }
  0x41   : > { %1070 = vst.msk [vmem:[%s5510_s8 + $0x8] sm:$0xff] %vm1068_vm0, %v1067_v1 }
  0x42 PF: > { %v4674_v2 = vld [vmem:[%s984_s29] sm:$0xff]   ;;  %v4793_v3 = vmov 0.0   ;;  %v4675_v4 = vld [vmem:[%s984_s29 + $0x8] sm:$0xff]   ;;  %vm4794_vm1 = vmmov 0   ;;  %s5511_s18 = sld [smem:[#allocation27_spill]]  ;;  %s5512_s1 = sld [smem:[#allocation6_spill]] }
  0x43   : > { %4285 = vmatprep.subr.bf16.mxu1 %v4793_v3  ;;  %4277 = vmatprep.subr.bf16.mxu0 %v4793_v3  ;;  %v4676_v7 = vld [vmem:[%s4945_s2] sm:$0xff]   ;;  %vm1092_vm2 = vcmask 261120   ;;  %v4677_v8 = vld [vmem:[%s4945_s2 + $0x8] sm:$0xff]   ;;  %vm1251_vm3 = vcmask 64512   ;;  %s4795_s29 = smov 120   ;;  %vm1339_vm5 = vcmask 130048  }
  0x44   : > { %4286 = vmatpush3.bf16.msra.mxu1 %v4674_v2  ;;  %4289 = vmatprep.mubr.msk.bf16.mxu1 %vm4794_vm1, %v4793_v3  ;;  %vm5073_vm4 = vmpackc.low %vm1251_vm3, %vm1251_vm3  ;;  %s4796_s2 = smov 112   ;;  %v4079_v61 = vld [vmem:[%s4958_s5 + $0x4] sm:$0xf]  ;;  %vm1653_vm6 = vcmask 1043456   ;;  %s4797_s26 = smov 104   ;;  %vm3648_vm7 = vcmask 523264  }
  0x45   : > { %4287 = vmatprep.subr.bf16.mxu1 %v4793_v3  ;;  %4281 = vmatprep.mubr.msk.bf16.mxu0 %vm4794_vm1, %v4793_v3  ;;  %s5515_s24 = sld [smem:[#allocation14_spill]]  ;;  %s5517_s8 = sld [smem:[#allocation9_spill]] }
  0x46   : > { %4278 = vmatpush3.bf16.msra.mxu0 %v4676_v7  ;;  %s5519_s16 = sld [smem:[#allocation15_spill]] }
  0x47   : > { %4279 = vmatprep.subr.bf16.mxu0 %v4793_v3 }
  0x48   : > { %v5047_v5 = vld [vmem:[%s5511_s18] sm:$0xff]  ;;  %v5052_v6 = vld [vmem:[%s5511_s18 + $0x8] sm:$0xff]  ;;  %4288 = vmatpush3.bf16.msra.mxu1 %v4675_v4  ;;  %v1655_v4 = vsel %vm1653_vm6, %v4079_v61, 0 }
  0x49   : > { %v1075_v9 = vpack.c.bf16 %v5052_v6, %v5047_v5  ;;  %v4678_v10 = vld [vmem:[%s5512_s1] sm:$0xff]   ;;  %v4679_v11 = vld [vmem:[%s5512_s1 + $0x8] sm:$0xff]  }
  0x4a   : > { %4280 = vmatpush3.bf16.msra.mxu0 %v4677_v8 }
  0x4b   : > { %4290 = vmatmul.mubr.msk.bf16.vlgmr.msra.gmra.mrb[0].mxu1 %vm1092_vm2, %v1075_v9  ;;  %4293 = vmatprep.subr.bf16.mxu0 %v4793_v3  ;;  %s5516_s20 = scalar_lea.vmem %s5515_s24, %s4935_s4 }
  0x4c   : > { %s5520_s3 = scalar_lea.vmem %s5519_s16, %s4935_s4 }
  0x4d   : > { %4282 = vmatmul.mubr.msk.bf16.vlgmr.msra.gmra.mrb[0].mxu0 %vm1092_vm2, %v1075_v9 }
  0x4e   : > { %4297 = vmatprep.mubr.msk.bf16.mxu0 %vm4794_vm1, %v4793_v3  ;;  %4294 = vmatpush3.bf16.msra.mxu0 %v4678_v10 }
  0x4f   : > { %4295 = vmatprep.subr.bf16.mxu0 %v4793_v3 }
  0x52   : > { %4296 = vmatpush3.bf16.msra.mxu0 %v4679_v11 }
  0x55   : > { %4298 = vmatmul.mubr.msk.bf16.vlgmr.msra.gmra.mrb[4].mxu0 %vm1092_vm2, %v1075_v9 }
 0x11e   : > { %v1187_v12 = vpop.f32.mrb[0].mxu1 }
 0x11f   : > { %v4291_v13 = vpop.f32.mrb[1].mxu1 }
 0x120   : > { %v1190_v14 = vpop.f32.mrb[2].mxu1  ;;  %v5079_v19 = vpop.f32.mrb[0].mxu0 }
 0x121   : > { %v4505_v16 = vpack.c.bf16 %v1190_v14, %v1187_v12  ;;  %v4292_v17 = vpop.f32.mrb[3].mxu1  ;;  %v5077_v18 = vpack.i.bf16 %v1190_v14, %v1187_v12  ;;  %v4283_v20 = vpop.f32.mrb[1].mxu0  ;;  %4305 = vmatprep.mubr.msk.f32.mxu1 %vm1251_vm3, %v5079_v19 }
 0x122   : > { %v5087_v21 = vpop.f32.mrb[2].mxu0 }
 0x123   : > { %4615 = vrot.lane.b32.xlu0 %v5077_v18, %s4795_s29  ;;  %4507 = vmatprep.subr.msk.bf16.mxu1 %vm5073_vm4, %v4505_v16  ;;  %v4284_v22 = vpop.f32.mrb[3].mxu0 }
 0x124   : > { %4510 = vmatpush3.bf16.xpose.msk.msra.mxu1 %vm5073_vm4, %v4505_v16  ;;  %1447 = vrot.lane.b32.xlu1 %v5087_v21, %s4795_s29 }
 0x127   : > { %1445 = vrot.lane.b32.xlu0 %v5079_v19, %s4795_s29 }
 0x128   : > { %v1244_v23 = vpop.f32.mrb[4].mxu0 }
 0x129   : > { %v4299_v24 = vpop.f32.mrb[5].mxu0 }
 0x12a   : > { %v1247_v25 = vpop.f32.mrb[6].mxu0 }
 0x12b   : > { %4306 = vmatmul.mubr.msk.f32.vlgmr.msra.gmra.mrb[4].mxu1 %vm1251_vm3, %v5087_v21  ;;  %v4300_v26 = vpop.f32.mrb[7].mxu0  ;;  %v4511_v27 = vpack.c.bf16 %v1247_v25, %v1244_v23  ;;  %v5104_v34 = vpack.i.bf16 %v1247_v25, %v1244_v23 }
 0x12d   : > { %4512 = vmatprep.subr.bf16.mxu1 %v4511_v27 }
 0x12e   : > { %4514 = vmatpush3.bf16.msra.mxu1 %v4511_v27 }
 0x12f   : > { %4335 = vmatprep.subr.bf16.mxu1 %v4793_v3 }
 0x195   : > { %v4616_v28 = vpop.permute.xlu0 %4615 }
 0x196   : > { %v4618_v29 = vunpack.i.h.bf16 %v4616_v28  ;;  %v4617_v30 = vunpack.i.l.bf16 %v4616_v28  ;;  %v1448_v33 = vpop.permute.xlu1 %1447 }
 0x198   : > { %v4515_v31 = vpack.c.bf16 %v4618_v29, %v4617_v30 }
 0x199   : > { %v1446_v32 = vpop.permute.xlu0 %1445 }
 0x19a   : > { %4517 = vmatprep.subr.msk.bf16.mxu0 %vm5073_vm4, %v4515_v31  ;;  %4319 = vmatprep.mubr.msk.f32.mxu0 %vm1251_vm3, %v1446_v32 }
 0x19b   : > { %4520 = vmatpush3.bf16.xpose.msk.msra.mxu0 %vm5073_vm4, %v4515_v31 }
 0x1a2   : > { %4320 = vmatmul.mubr.msk.f32.vlgmr.msra.gmra.mrb[8].mxu0 %vm1251_vm3, %v1448_v33  ;;  %v1444_v33 = vld [vmem:[%s4958_s5] sm:$0xf] }
 0x1fe   : > { %v5106_v35 = vpop.f32.mrb[4].mxu1 }
 0x1ff   : > { %v5108_v36 = vpop.f32.mrb[5].mxu1  ;;  %v1343_v52 = vsel %vm1339_vm5, %v5106_v35, -inf }
 0x200   : > { %v1340_v51 = vsel %vm1339_vm5, %v5108_v36, -inf }
 0x275   : > { %v4321_v37 = vpop.f32.mrb[8].mxu0 }
 0x276   : > { %v1527_v38 = vpop.f32.mrb[9].mxu0  ;;  %v1539_v39 = vsel %vm1339_vm5, %v4321_v37, -inf }
 0x277   : > { %1540 = vmax.xlane.f32.xlu0 %v1539_v39  ;;  %v1536_v40 = vsel %vm1339_vm5, %v1527_v38, -inf }
 0x278   : > { %1537 = vmax.xlane.f32.xlu1 %v1536_v40 }
 0x304   : > { %v1541_v41 = vpop.xlane.xlu0 %1540 }
 0x305   : > { %v1543_v42 = vsub.f32 %v4321_v37, %v1541_v41  ;;  %v1538_v43 = vpop.xlane.xlu1 %1537 }
 0x306   : > { %v1542_v44 = vsub.f32 %v1527_v38, %v1538_v43 }
 0x307   : > { %v1546_v45 = vmul.f32 1.442695, %v1543_v42 }
 0x308   : > { %v1544_v46 = vmul.f32 1.442695, %v1542_v44 }
 0x309   : > { %4693 = vpow2.f32 %v1546_v45 }
 0x30a   : > { %4695 = vpow2.f32 %v1544_v46 }
 0x313   : > { %v4694_v47 = vpop.eup %4693 }
 0x314   : > { %v4696_v48 = vpop.eup %4695  ;;  %v1551_v49 = vsel %vm1339_vm5, %v4694_v47, 0.0 }
 0x315   : > { %1552 = vadd.xlane.f32.xlu1 %v1551_v49  ;;  %v1548_v50 = vsel %vm1339_vm5, %v4696_v48, 0.0 }
 0x316   : > { %1549 = vadd.xlane.f32.xlu0 %v1548_v50 }
 0x326   : > { %4625 = vrot.lane.b32.xlu1 %v5077_v18, %s4796_s2 }
 0x32a   : > { %1745 = vrot.lane.b32.xlu1 %v5079_v19, %s4796_s2 }
 0x32c   : > { %4620 = vrot.lane.b32.xlu0 %v5104_v34, %s4795_s29 }
 0x330   : > { %1747 = vrot.lane.b32.xlu0 %v5087_v21, %s4796_s2 }
 0x34e   : > { %1341 = vmax.xlane.f32.xlu1 %v1340_v51 }
 0x34f   : > { %1344 = vmax.xlane.f32.xlu0 %v1343_v52 }
 0x3a2   : > { %v1553_v53 = vpop.xlane.xlu1 %1552 }
 0x3a3   : > { %4697 = vrcp.f32 %v1553_v53  ;;  %v1550_v54 = vpop.xlane.xlu0 %1549 }
 0x3a4   : > { %4699 = vrcp.f32 %v1550_v54 }
 0x3a6   : > { %v4626_v59 = vpop.permute.xlu1 %4625 }
 0x3a7   : > { %v4621_v55 = vpop.permute.xlu0 %4620  ;;  %v4628_v63 = vunpack.i.h.bf16 %v4626_v59  ;;  %v4627_v0 = vunpack.i.l.bf16 %v4626_v59 }
 0x3a8   : > { %v4623_v56 = vunpack.i.h.bf16 %v4621_v55  ;;  %v4622_v57 = vunpack.i.l.bf16 %v4621_v55 }
 0x3a9   : > { %v4525_v7 = vpack.c.bf16 %v4628_v63, %v4627_v0 }
 0x3aa   : > { %v4521_v58 = vpack.c.bf16 %v4623_v56, %v4622_v57  ;;  %v1746_v8 = vpop.permute.xlu1 %1745 }
 0x3ab   : > { %v1748_v9 = vpop.permute.xlu0 %1747 }
 0x3ac   : > { %4522 = vmatprep.subr.bf16.mxu0 %v4521_v58 }
 0x3ad   : > { %v4698_v60 = vpop.eup %4697  ;;  %4524 = vmatpush3.bf16.msra.mxu0 %v4521_v58 }
 0x3ae   : > { %v4700_v62 = vpop.eup %4699  ;;  %4329 = vmatprep.subr.bf16.mxu0 %v4793_v3  ;;  %v1557_v2 = vmul.f32 %v4698_v60, %v4694_v47 }
 0x3af   : > { %v1556_v1 = vmul.f32 %v4700_v62, %v4696_v48 }
 0x3b1   : > { %4326 = vmatprep.mubr.msk.f32.mxu0 %vm1339_vm5, %v1556_v1 }
 0x3b2   : > { %4327 = vmatmul.mubr.msk.f32.vlgmr.msra.gmra.mrb[10].mxu0 %vm1339_vm5, %v1557_v2 }
 0x3b3   : > { %4330 = vmatpush3.bf16.msra.mxu0 %v1655_v4  ;;  %4331 = vmatprep.mubr.msk.bf16.mxu0 %vm4794_vm1, %v4793_v3 }
 0x3b4   : > { %4527 = vmatprep.subr.msk.bf16.mxu0 %vm5073_vm4, %v4525_v7 }
 0x3db   : > { %v1342_v10 = vpop.xlane.xlu1 %1341 }
 0x3dc   : > { %v1346_v11 = vsub.f32 %v5108_v36, %v1342_v10  ;;  %v1345_v12 = vpop.xlane.xlu0 %1344 }
 0x3dd   : > { %v1347_v13 = vsub.f32 %v5106_v35, %v1345_v12  ;;  %v1702_v35 = vsel %vm1653_vm6, %v1444_v33, 0 }
 0x3de   : > { %v1348_v14 = vmul.f32 1.442695, %v1346_v11 }
 0x3df   : > { %v1350_v16 = vmul.f32 1.442695, %v1347_v13 }
 0x3e0   : > { %4701 = vpow2.f32 %v1348_v14 }
 0x3e1   : > { %4703 = vpow2.f32 %v1350_v16  ;;  %v4088_v16 = vld [vmem:[%s4958_s5 + $0x8] sm:$0xf] }
 0x3ea   : > { %v4702_v17 = vpop.eup %4701 }
 0x3eb   : > { %v4704_v20 = vpop.eup %4703  ;;  %v1352_v22 = vsel %vm1339_vm5, %v4702_v17, 0.0 }
 0x3ec   : > { %1353 = vadd.xlane.f32.xlu0 %v1352_v22  ;;  %v1355_v23 = vsel %vm1339_vm5, %v4704_v20, 0.0 }
 0x3ed   : > { %1356 = vadd.xlane.f32.xlu1 %v1355_v23 }
 0x479   : > { %v1354_v24 = vpop.xlane.xlu0 %1353 }
 0x47a   : > { %4705 = vrcp.f32 %v1354_v24  ;;  %v1357_v25 = vpop.xlane.xlu1 %1356 }
 0x47b   : > { %4707 = vrcp.f32 %v1357_v25 }
 0x484   : > { %v4706_v26 = vpop.eup %4705 }
 0x485   : > { %v4708_v27 = vpop.eup %4707  ;;  %v4328_v28 = vpop.f32.mrb[10].mxu0  ;;  %v1360_v29 = vmul.f32 %v4706_v26, %v4702_v17  ;;  %v1952_v17 = vsel %vm1653_vm6, %v4088_v16, 0 }
 0x486   : > { %v1361_v30 = vmul.f32 %v4708_v27, %v4704_v20  ;;  %v1638_v31 = vpop.f32.mrb[11].mxu0 }
 0x487   : > { %v1647_v32 = vpack.c.bf16 %v4328_v28, %v1638_v31  ;;  %4312 = vmatprep.mubr.msk.f32.mxu1 %vm1339_vm5, %v1360_v29 }
 0x488   : > { %4313 = vmatmul.mubr.msk.f32.vlgmr.msra.gmra.mrb[6].mxu1 %vm1339_vm5, %v1361_v30 }
 0x489   : > { %4332 = vmatmul.mubr.msk.bf16.vlgmr.msra.gmra.mrb[12].mxu0 %vm1251_vm3, %v1647_v32  ;;  %4337 = vmatprep.mubr.msk.bf16.mxu1 %vm4794_vm1, %v4793_v3 }
 0x48a   : > { %4530 = vmatpush3.bf16.xpose.msk.msra.mxu0 %vm5073_vm4, %v4525_v7  ;;  %4345 = vmatprep.mubr.msk.f32.mxu0 %vm1251_vm3, %v1746_v8 }
 0x48b   : > { %4355 = vmatprep.subr.bf16.mxu0 %v4793_v3  ;;  %4336 = vmatpush3.bf16.msra.mxu1 %v1702_v35 }
 0x491   : > { %4346 = vmatmul.mubr.msk.f32.vlgmr.msra.gmra.mrb[16].mxu0 %vm1251_vm3, %v1748_v9 }
 0x492   : > { %4357 = vmatprep.mubr.msk.bf16.mxu0 %vm4794_vm1, %v4793_v3  ;;  %4356 = vmatpush3.bf16.msra.mxu0 %v1952_v17  ;;  %v4680_v17 = vld [vmem:[%s4976_s19] sm:$0xff]  }
 0x55b   : > { %v4314_v36 = vpop.f32.mrb[6].mxu1 }
 0x55c   : > { %v1434_v37 = vpop.f32.mrb[7].mxu1  ;;  %v1691_v38 = vpop.f32.mrb[12].mxu0 }
 0x55d   : > { %v1443_v39 = vpack.c.bf16 %v4314_v36, %v1434_v37  ;;  %v4333_v40 = vpop.f32.mrb[13].mxu0 }
 0x55e   : > { %v1694_v41 = vpop.f32.mrb[14].mxu0 }
 0x55f   : > { %v4334_v42 = vpop.f32.mrb[15].mxu0  ;;  %4338 = vmatmul.mubr.msk.bf16.vlgmr.msra.gmra.mrb[8].mxu1 %vm1251_vm3, %v1443_v39 }
 0x564   : > { %v4347_v43 = vpop.f32.mrb[16].mxu0 }
 0x565   : > { %v1827_v44 = vpop.f32.mrb[17].mxu0  ;;  %v1839_v45 = vsel %vm1339_vm5, %v4347_v43, -inf }
 0x566   : > { %1840 = vmax.xlane.f32.xlu1 %v1839_v45  ;;  %v1836_v46 = vsel %vm1339_vm5, %v1827_v44, -inf }
 0x567   : > { %1837 = vmax.xlane.f32.xlu0 %v1836_v46 }
 0x5f3   : > { %v1841_v47 = vpop.xlane.xlu1 %1840 }
 0x5f4   : > { %v1843_v48 = vsub.f32 %v4347_v43, %v1841_v47  ;;  %v1838_v49 = vpop.xlane.xlu0 %1837 }
 0x5f5   : > { %v1842_v50 = vsub.f32 %v1827_v44, %v1838_v49 }
 0x5f6   : > { %v1846_v51 = vmul.f32 1.442695, %v1843_v48 }
 0x5f7   : > { %v1844_v52 = vmul.f32 1.442695, %v1842_v50 }
 0x5f8   : > { %4709 = vpow2.f32 %v1846_v51 }
 0x5f9   : > { %4711 = vpow2.f32 %v1844_v52 }
 0x602   : > { %v4710_v53 = vpop.eup %4709 }
 0x603   : > { %v4712_v54 = vpop.eup %4711  ;;  %v1851_v55 = vsel %vm1339_vm5, %v4710_v53, 0.0 }
 0x604   : > { %1852 = vadd.xlane.f32.xlu1 %v1851_v55  ;;  %v1848_v56 = vsel %vm1339_vm5, %v4712_v54, 0.0 }
 0x605   : > { %1849 = vadd.xlane.f32.xlu0 %v1848_v56 }
 0x615   : > { %4635 = vrot.lane.b32.xlu1 %v5077_v18, %s4797_s26 }
 0x619   : > { %1997 = vrot.lane.b32.xlu1 %v5079_v19, %s4797_s26 }
 0x61b   : > { %4630 = vrot.lane.b32.xlu0 %v5104_v34, %s4796_s2 }
 0x61f   : > { %1999 = vrot.lane.b32.xlu0 %v5087_v21, %s4797_s26 }
 0x632   : > { %v1738_v57 = vpop.f32.mrb[8].mxu1 }
 0x633   : > { %v1739_v58 = vadd.f32 %v1738_v57, %v1691_v38  ;;  %v4339_v59 = vpop.f32.mrb[9].mxu1 }
 0x634   : > { %v1741_v60 = vpop.f32.mrb[10].mxu1 }
 0x635   : > { %v1742_v61 = vadd.f32 %v1741_v60, %v1694_v41  ;;  %v4340_v62 = vpop.f32.mrb[11].mxu1  ;;  %v4098_v60 = vld [vmem:[%s5516_s20] ss:$0 sm:$0xff]  ;;  %s5525_s20 = sld [smem:[#allocation21_spill]] }
 0x691   : > { %v1853_v63 = vpop.xlane.xlu1 %1852 }
 0x692   : > { %4713 = vrcp.f32 %v1853_v63  ;;  %v1850_v0 = vpop.xlane.xlu0 %1849 }
 0x693   : > { %4715 = vrcp.f32 %v1850_v0 }
 0x695   : > { %v4636_v18 = vpop.permute.xlu1 %4635 }
 0x696   : > { %v4631_v1 = vpop.permute.xlu0 %4630  ;;  %v4638_v2 = vunpack.i.h.bf16 %v4636_v18  ;;  %v4637_v19 = vunpack.i.l.bf16 %v4636_v18 }
 0x697   : > { %v4633_v4 = vunpack.i.h.bf16 %v4631_v1  ;;  %v4632_v7 = vunpack.i.l.bf16 %v4631_v1 }
 0x698   : > { %v4535_v9 = vpack.c.bf16 %v4638_v2, %v4637_v19 }
 0x699   : > { %v4531_v8 = vpack.c.bf16 %v4633_v4, %v4632_v7  ;;  %v1998_v13 = vpop.permute.xlu1 %1997 }
 0x69a   : > { %v2000_v14 = vpop.permute.xlu0 %1999 }
 0x69b   : > { %4532 = vmatprep.subr.bf16.mxu1 %v4531_v8 }
 0x69c   : > { %v4714_v21 = vpop.eup %4713  ;;  %4534 = vmatpush3.bf16.msra.mxu1 %v4531_v8 }
 0x69d   : > { %v4716_v10 = vpop.eup %4715  ;;  %4537 = vmatprep.subr.msk.bf16.mxu1 %vm5073_vm4, %v4535_v9  ;;  %v1857_v12 = vmul.f32 %v4714_v21, %v4710_v53 }
 0x69e   : > { %v1856_v11 = vmul.f32 %v4716_v10, %v4712_v54  ;;  %v4096_v54 = vld [vmem:[%s4958_s5 + $0xc] sm:$0xf]  ;;  %s5526_s5 = scalar_lea.vmem %s5525_s20, %s4935_s4 }
 0x69f   : > { %v2204_v55 = vsel %vm1653_vm6, %v4096_v54, 0 }
 0x6a0   : > { %4352 = vmatprep.mubr.msk.f32.mxu1 %vm1339_vm5, %v1856_v11 }
 0x6a1   : > { %4353 = vmatmul.mubr.msk.f32.vlgmr.msra.gmra.mrb[12].mxu1 %vm1339_vm5, %v1857_v12 }
 0x6a2   : > { %4365 = vmatprep.mubr.msk.f32.mxu1 %vm1251_vm3, %v1998_v13 }
 0x6a5   : > { %4540 = vmatpush3.bf16.xpose.msk.msra.mxu1 %vm5073_vm4, %v4535_v9 }
 0x6a6   : > { %4375 = vmatprep.subr.bf16.mxu1 %v4793_v3 }
 0x6ac   : > { %4366 = vmatmul.mubr.msk.f32.vlgmr.msra.gmra.mrb[14].mxu1 %vm1251_vm3, %v2000_v14 }
 0x6ad   : > { %4377 = vmatprep.mubr.msk.bf16.mxu1 %vm4794_vm1, %v4793_v3  ;;  %4376 = vmatpush3.bf16.msra.mxu1 %v2204_v55 }
 0x6ae   : > { %4389 = vmatprep.subr.bf16.mxu1 %v4793_v3 }
 0x774   : > { %v4354_v20 = vpop.f32.mrb[12].mxu1 }
 0x775   : > { %v1936_v22 = vpop.f32.mrb[13].mxu1 }
 0x776   : > { %v1945_v23 = vpack.c.bf16 %v4354_v20, %v1936_v22  ;;  %v4681_v20 = vld [vmem:[%s4976_s19 + $0x8] sm:$0xff]   ;;  %v4682_v22 = vld [vmem:[%s5517_s8] sm:$0xff]   ;;  %s5527_s19 = scalar_lea.vmem %s5450_s17, %s4935_s4 }
 0x778   : > { %4358 = vmatmul.mubr.msk.bf16.vlgmr.msra.gmra.mrb[20].mxu0 %vm1251_vm3, %v1945_v23  ;;  %v4683_v23 = vld [vmem:[%s4971_s21] sm:$0xff]  }
 0x77f   : > { %v4367_v24 = vpop.f32.mrb[14].mxu1 }
 0x780   : > { %v2079_v25 = vpop.f32.mrb[15].mxu1  ;;  %v2091_v26 = vsel %vm1339_vm5, %v4367_v24, -inf }
 0x781   : > { %2092 = vmax.xlane.f32.xlu0 %v2091_v26  ;;  %v2088_v27 = vsel %vm1339_vm5, %v2079_v25, -inf }
 0x782   : > { %2089 = vmax.xlane.f32.xlu1 %v2088_v27 }
 0x80e   : > { %v2093_v28 = vpop.xlane.xlu0 %2092 }
 0x80f   : > { %v2095_v29 = vsub.f32 %v4367_v24, %v2093_v28  ;;  %v2090_v30 = vpop.xlane.xlu1 %2089  ;;  %v4684_v24 = vld [vmem:[%s4971_s21 + $0x8] sm:$0xff]   ;;  %s5518_s21 = scalar_lea.vmem %s5440_s7, %s4935_s4 }
 0x810   : > { %v2094_v31 = vsub.f32 %v2079_v25, %v2090_v30 }
 0x811   : > { %v2098_v32 = vmul.f32 1.442695, %v2095_v29 }
 0x812   : > { %v2096_v33 = vmul.f32 1.442695, %v2094_v31 }
 0x813   : > { %4717 = vpow2.f32 %v2098_v32 }
 0x814   : > { %4719 = vpow2.f32 %v2096_v33  ;;  %v4099_v33 = vld [vmem:[%s5518_s21] ss:$0 sm:$0xff] }
 0x81d   : > { %v4718_v35 = vpop.eup %4717 }
 0x81e   : > { %v4720_v36 = vpop.eup %4719  ;;  %v2103_v37 = vsel %vm1339_vm5, %v4718_v35, 0.0 }
 0x81f   : > { %2104 = vadd.xlane.f32.xlu1 %v2103_v37  ;;  %v2100_v38 = vsel %vm1339_vm5, %v4720_v36, 0.0 }
 0x820   : > { %2101 = vadd.xlane.f32.xlu0 %v2100_v38  ;;  %v4100_v38 = vld [vmem:[%s5520_s3] ss:$0 sm:$0xff] }
 0x836   : > { %4640 = vrot.lane.b32.xlu0 %v5104_v34, %s4797_s26 }
 0x84b   : > { %v1988_v39 = vpop.f32.mrb[20].mxu0 }
 0x84c   : > { %v1995_v40 = vadd.f32 %v1988_v39, %v1739_v58  ;;  %v4359_v41 = vpop.f32.mrb[21].mxu0 }
 0x84d   : > { %v1991_v42 = vpop.f32.mrb[22].mxu0 }
 0x84e   : > { %v1996_v43 = vadd.f32 %v1991_v42, %v1742_v61  ;;  %v4360_v44 = vpop.f32.mrb[23].mxu0 }
 0x8ac   : > { %v2105_v45 = vpop.xlane.xlu1 %2104 }
 0x8ad   : > { %4721 = vrcp.f32 %v2105_v45  ;;  %v2102_v46 = vpop.xlane.xlu0 %2101 }
 0x8ae   : > { %4723 = vrcp.f32 %v2102_v46 }
 0x8b1   : > { %v4641_v47 = vpop.permute.xlu0 %4640 }
 0x8b2   : > { %v4643_v48 = vunpack.i.h.bf16 %v4641_v47  ;;  %v4642_v49 = vunpack.i.l.bf16 %v4641_v47 }
 0x8b4   : > { %v4541_v50 = vpack.c.bf16 %v4643_v48, %v4642_v49  ;;  %v4685_v49 = vld [vmem:[%s4981_s6] sm:$0xff]  }
 0x8b6   : > { %4542 = vmatprep.subr.bf16.mxu0 %v4541_v50 }
 0x8b7   : > { %v4722_v51 = vpop.eup %4721  ;;  %4544 = vmatpush3.bf16.msra.mxu0 %v4541_v50  ;;  %v4686_v50 = vld [vmem:[%s4981_s6 + $0x8] sm:$0xff]   ;;  %s5521_s6 = sld [smem:[#allocation7_spill]] }
 0x8b8   : > { %v4724_v52 = vpop.eup %4723  ;;  %4381 = vmatprep.subr.bf16.mxu0 %v4793_v3  ;;  %v2109_v53 = vmul.f32 %v4722_v51, %v4718_v35 }
 0x8b9   : > { %v2108_v34 = vmul.f32 %v4724_v52, %v4720_v36 }
 0x8bb   : > { %4372 = vmatprep.mubr.msk.f32.mxu0 %vm1339_vm5, %v2108_v34 }
 0x8bc   : > { %4373 = vmatmul.mubr.msk.f32.vlgmr.msra.gmra.mrb[18].mxu0 %vm1339_vm5, %v2109_v53 }
 0x8bd   : > { %4385 = vmatprep.mubr.msk.bf16.mxu0 %vm4794_vm1, %v4793_v3  ;;  %4382 = vmatpush3.bf16.msra.mxu0 %v4683_v23 }
 0x8be   : > { %4383 = vmatprep.subr.bf16.mxu0 %v4793_v3 }
 0x8c1   : > { %4384 = vmatpush3.bf16.msra.mxu0 %v4684_v24 }
 0x8c2   : > { %4397 = vmatprep.subr.bf16.mxu0 %v4793_v3 }
 0x98f   : > { %v4374_v56 = vpop.f32.mrb[18].mxu0 }
 0x990   : > { %v2188_v57 = vpop.f32.mrb[19].mxu0 }
 0x991   : > { %v2197_v58 = vpack.c.bf16 %v4374_v56, %v2188_v57 }
 0x993   : > { %4378 = vmatmul.mubr.msk.bf16.vlgmr.msra.gmra.mrb[16].mxu1 %vm1251_vm3, %v2197_v58 }
 0x994   : > { %4393 = vmatprep.mubr.msk.bf16.mxu1 %vm4794_vm1, %v4793_v3  ;;  %4390 = vmatpush3.bf16.msra.mxu1 %v4680_v17 }
 0x995   : > { %4391 = vmatprep.subr.bf16.mxu1 %v4793_v3 }
 0x998   : > { %4392 = vmatpush3.bf16.msra.mxu1 %v4681_v20 }
 0x99b   : > { %4394 = vmatmul.mubr.msk.bf16.vlgmr.msra.gmra.mrb[20].mxu1 %vm1092_vm2, %v4682_v22 }
 0xa66   : > { %v2240_v59 = vpop.f32.mrb[16].mxu1 }
 0xa67   : > { %v2247_v61 = vadd.f32 %v2240_v59, %v1995_v40  ;;  %v4379_v62 = vpop.f32.mrb[17].mxu1 }
 0xa68   : > { %v2243_v63 = vpop.f32.mrb[18].mxu1 }
 0xa69   : > { %v2256_v0 = vadd.f32 %v4098_v60, %v2247_v61  ;;  %v2248_v18 = vadd.f32 %v2243_v63, %v1996_v43  ;;  %v4380_v1 = vpop.f32.mrb[19].mxu1 }
 0xa6b   : > { %v2257_v2 = vadd.f32 %v4098_v60, %v2248_v18  ;;  %v2258_v19 = vadd.f32 %v2256_v0, %v5047_v5 }
 0xa6d   : > { %v2260_v4 = vsel %vm1092_vm2, %v2258_v19, 0.0  ;;  %v2259_v7 = vadd.f32 %v2257_v2, %v5052_v6 }
 0xa6e   : > { %2261 = vadd.xlane.f32.xlu1 %v2260_v4  ;;  %v2424_v43 = vpop.f32.mrb[20].mxu1 }
 0xa6f   : > { %v2263_v8 = vsel %vm1092_vm2, %v2259_v7, 0.0  ;;  %v4395_v44 = vpop.f32.mrb[21].mxu1 }
 0xa70   : > { %v2427_v45 = vpop.f32.mrb[22].mxu1 }
 0xa71   : > { %v4545_v46 = vpack.c.bf16 %v2427_v45, %v2424_v43  ;;  %v4396_v47 = vpop.f32.mrb[23].mxu1  ;;  %v5238_v48 = vpack.i.bf16 %v2427_v45, %v2424_v43 }
 0xa72   : > { %2264 = vadd.xlane.f32.xlu1 %v2263_v8 }
 0xa73   : > { %4547 = vmatprep.subr.msk.bf16.mxu1 %vm5073_vm4, %v4545_v46 }
 0xa74   : > { %4550 = vmatpush3.bf16.xpose.msk.msra.mxu1 %vm5073_vm4, %v4545_v46 }
 0xafb   : > { %v2262_v9 = vpop.xlane.xlu1 %2261 }
 0xafc   : > { %v2267_v21 = vmul.f32 0.03125, %v2262_v9 }
 0xafe   : > { %v2269_v10 = vsub.f32 %v2258_v19, %v2267_v21 }
 0xaff   : > { %v2265_v11 = vpop.xlane.xlu1 %2264 }
 0xb00   : > { %v2268_v12 = vmul.f32 0.03125, %v2265_v11  ;;  %v2271_v13 = vmul.f32 %v2269_v10, %v2269_v10 }
 0xb02   : > { %v2270_v14 = vsub.f32 %v2259_v7, %v2268_v12  ;;  %v2273_v5 = vsel %vm1092_vm2, %v2271_v13, 0.0 }
 0xb03   : > { %2274 = vadd.xlane.f32.xlu1 %v2273_v5 }
 0xb04   : > { %v2272_v16 = vmul.f32 %v2270_v14, %v2270_v14 }
 0xb06   : > { %v2276_v6 = vsel %vm1092_vm2, %v2272_v16, 0.0 }
 0xb07   : > { %2277 = vadd.xlane.f32.xlu1 %v2276_v6 }
 0xb18   : > { %4645 = vrot.lane.b32.xlu1 %v5238_v48, %s4795_s29 }
 0xb90   : > { %v2275_v25 = vpop.xlane.xlu1 %2274 }
 0xb91   : > { %v2279_v26 = vmul.f32 0.03125, %v2275_v25 }
 0xb93   : > { %v2281_v27 = vadd.f32 1e-05, %v2279_v26 }
 0xb94   : > { %v2278_v28 = vpop.xlane.xlu1 %2277 }
 0xb95   : > { %4725 = vrsqrt.f32 %v2281_v27  ;;  %v2280_v29 = vmul.f32 0.03125, %v2278_v28 }
 0xb97   : > { %v2282_v30 = vadd.f32 1e-05, %v2280_v29 }
 0xb98   : > { %v4646_v51 = vpop.permute.xlu1 %4645 }
 0xb99   : > { %4727 = vrsqrt.f32 %v2282_v30  ;;  %v4648_v52 = vunpack.i.h.bf16 %v4646_v51  ;;  %v4647_v34 = vunpack.i.l.bf16 %v4646_v51 }
 0xb9b   : > { %v4555_v53 = vpack.c.bf16 %v4648_v52, %v4647_v34 }
 0xb9f   : > { %v4726_v31 = vpop.eup %4725 }
 0xba0   : > { %v2285_v32 = vmul.f32 %v4726_v31, %v2269_v10 }
 0xba2   : > { %v2294_v36 = vmul.f32 %v4099_v33, %v2285_v32 }
 0xba3   : > { %v4728_v35 = vpop.eup %4727 }
 0xba4   : > { %v2286_v37 = vmul.f32 %v4728_v35, %v2270_v14  ;;  %v5229_v40 = vadd.f32 %v4100_v38, %v2294_v36  ;;  %v4123_v35 = vld [vmem:[%s5521_s6 + $0x4] sm:$0xf] }
 0xba5   : > { %v2889_v36 = vsel %vm1653_vm6, %v4123_v35, 0 }
 0xba6   : > { %v2295_v39 = vmul.f32 %v4099_v33, %v2286_v37 }
 0xba8   : > { %v5231_v41 = vadd.f32 %v4100_v38, %v2295_v39 }
 0xbaa   : > { %v2305_v42 = vpack.c.bf16 %v5231_v41, %v5229_v40 }
 0xbac   : > { %4386 = vmatmul.mubr.msk.bf16.vlgmr.msra.gmra.mrb[24].mxu0 %vm1092_vm2, %v2305_v42 }
 0xbad   : > { %4401 = vmatprep.mubr.msk.bf16.mxu0 %vm4794_vm1, %v4793_v3  ;;  %4398 = vmatpush3.bf16.msra.mxu0 %v4685_v49 }
 0xbae   : > { %4399 = vmatprep.subr.bf16.mxu0 %v4793_v3 }
 0xbb1   : > { %4400 = vmatpush3.bf16.msra.mxu0 %v4686_v50 }
 0xbb2   : > { %4557 = vmatprep.subr.msk.bf16.mxu0 %vm5073_vm4, %v4555_v53 }
 0xbb4   : > { %4402 = vmatmul.mubr.msk.bf16.vlgmr.msra.gmra.mrb[28].mxu0 %vm1092_vm2, %v4682_v22 }
 0xbba   : > { %4560 = vmatpush3.bf16.xpose.msk.msra.mxu0 %vm5073_vm4, %v4555_v53 }
 0xbbb   : > { %4433 = vmatprep.subr.bf16.mxu0 %v4793_v3 }
 0xc7f   : > { %v5255_v54 = vpop.f32.mrb[24].mxu0 }
 0xc80   : > { %2680 = vrot.lane.b32.xlu0 %v5255_v54, %s4795_s29  ;;  %v4387_v55 = vpop.f32.mrb[25].mxu0  ;;  %4409 = vmatprep.mubr.msk.f32.mxu1 %vm1251_vm3, %v5255_v54 }
 0xc81   : > { %v5261_v56 = vpop.f32.mrb[26].mxu0 }
 0xc82   : > { %v4388_v57 = vpop.f32.mrb[27].mxu0  ;;  %4410 = vmatmul.mubr.msk.f32.vlgmr.msra.gmra.mrb[24].mxu1 %vm1251_vm3, %v5261_v56 }
 0xc83   : > { %v2679_v57 = vld [vmem:[%s5521_s6] sm:$0xf] }
 0xc84   : > { %2682 = vrot.lane.b32.xlu0 %v5261_v56, %s4795_s29 }
 0xc87   : > { %v2481_v58 = vpop.f32.mrb[28].mxu0 }
 0xc88   : > { %v4403_v59 = vpop.f32.mrb[29].mxu0 }
 0xc89   : > { %v2484_v60 = vpop.f32.mrb[30].mxu0 }
 0xc8a   : > { %v4404_v61 = vpop.f32.mrb[31].mxu0  ;;  %v4551_v62 = vpack.c.bf16 %v2484_v60, %v2481_v58  ;;  %v5271_v18 = vpack.i.bf16 %v2484_v60, %v2481_v58  ;;  %v2936_v60 = vsel %vm1653_vm6, %v2679_v57, 0 }
 0xc8c   : > { %4552 = vmatprep.subr.bf16.mxu1 %v4551_v62 }
 0xc8d   : > { %4554 = vmatpush3.bf16.msra.mxu1 %v4551_v62 }
 0xcf2   : > { %v2681_v63 = vpop.permute.xlu0 %2680 }
 0xcf3   : > { %4423 = vmatprep.mubr.msk.f32.mxu0 %vm1251_vm3, %v2681_v63 }
 0xcf6   : > { %v2683_v0 = vpop.permute.xlu0 %2682 }
 0xcf7   : > { %4424 = vmatmul.mubr.msk.f32.vlgmr.msra.gmra.mrb[32].mxu0 %vm1251_vm3, %v2683_v0 }
 0xcf8   : > { %4435 = vmatprep.mubr.msk.bf16.mxu0 %vm4794_vm1, %v4793_v3  ;;  %4434 = vmatpush3.bf16.msra.mxu0 %v2889_v36 }
 0xd55   : > { %v4411_v1 = vpop.f32.mrb[24].mxu1 }
 0xd56   : > { %v2566_v2 = vpop.f32.mrb[25].mxu1  ;;  %v2578_v19 = vsel %vm1339_vm5, %v4411_v1, -inf }
 0xd57   : > { %2579 = vmax.xlane.f32.xlu1 %v2578_v19  ;;  %v2575_v4 = vsel %vm1339_vm5, %v2566_v2, -inf }
 0xd58   : > { %2576 = vmax.xlane.f32.xlu0 %v2575_v4 }
 0xdca   : > { %v4425_v7 = vpop.f32.mrb[32].mxu0 }
 0xdcb   : > { %v2762_v8 = vpop.f32.mrb[33].mxu0  ;;  %v2774_v21 = vsel %vm1339_vm5, %v4425_v7, -inf }
 0xdcc   : > { %v2771_v9 = vsel %vm1339_vm5, %v2762_v8, -inf }
 0xdcd   : > { %2772 = vmax.xlane.f32.xlu0 %v2771_v9 }
 0xdd1   : > { %2775 = vmax.xlane.f32.xlu0 %v2774_v21 }
 0xde4   : > { %v2580_v10 = vpop.xlane.xlu1 %2579 }
 0xde5   : > { %v2582_v11 = vsub.f32 %v4411_v1, %v2580_v10  ;;  %v2577_v12 = vpop.xlane.xlu0 %2576 }
 0xde6   : > { %v2581_v13 = vsub.f32 %v2566_v2, %v2577_v12 }
 0xde7   : > { %v2585_v14 = vmul.f32 1.442695, %v2582_v11 }
 0xde8   : > { %v2583_v5 = vmul.f32 1.442695, %v2581_v13 }
 0xde9   : > { %4729 = vpow2.f32 %v2585_v14 }
 0xdea   : > { %4731 = vpow2.f32 %v2583_v5 }
 0xdf3   : > { %v4730_v16 = vpop.eup %4729 }
 0xdf4   : > { %v4732_v6 = vpop.eup %4731  ;;  %v2590_v17 = vsel %vm1339_vm5, %v4730_v16, 0.0 }
 0xdf5   : > { %2591 = vadd.xlane.f32.xlu1 %v2590_v17  ;;  %v2587_v20 = vsel %vm1339_vm5, %v4732_v6, 0.0 }
 0xdf6   : > { %2588 = vadd.xlane.f32.xlu0 %v2587_v20 }
 0xe5a   : > { %v2773_v22 = vpop.xlane.xlu0 %2772 }
 0xe5b   : > { %v2777_v23 = vsub.f32 %v2762_v8, %v2773_v22 }
 0xe5d   : > { %v2779_v24 = vmul.f32 1.442695, %v2777_v23 }
 0xe5e   : > { %v2776_v25 = vpop.xlane.xlu0 %2775 }
 0xe5f   : > { %4733 = vpow2.f32 %v2779_v24  ;;  %v2778_v26 = vsub.f32 %v4425_v7, %v2776_v25 }
 0xe61   : > { %v2781_v27 = vmul.f32 1.442695, %v2778_v26 }
 0xe63   : > { %4735 = vpow2.f32 %v2781_v27 }
 0xe69   : > { %v4734_v28 = vpop.eup %4733 }
 0xe6a   : > { %v2783_v29 = vsel %vm1339_vm5, %v4734_v28, 0.0 }
 0xe6b   : > { %2784 = vadd.xlane.f32.xlu0 %v2783_v29 }
 0xe6d   : > { %v4736_v30 = vpop.eup %4735 }
 0xe6e   : > { %v2786_v31 = vsel %vm1339_vm5, %v4736_v30, 0.0 }
 0xe6f   : > { %2787 = vadd.xlane.f32.xlu1 %v2786_v31 }
 0xe80   : > { %4655 = vrot.lane.b32.xlu1 %v5238_v48, %s4796_s2 }
 0xe81   : > { %4650 = vrot.lane.b32.xlu0 %v5271_v18, %s4795_s29  ;;  %s5522_s29 = scalar_lea.vmem %s5446_s13, %s4935_s4 }
 0xe82   : > { %v2592_v32 = vpop.xlane.xlu1 %2591 }
 0xe83   : > { %4737 = vrcp.f32 %v2592_v32  ;;  %v2589_v33 = vpop.xlane.xlu0 %2588 }
 0xe84   : > { %4739 = vrcp.f32 %v2589_v33  ;;  %2979 = vrot.lane.b32.xlu1 %v5255_v54, %s4796_s2 }
 0xe85   : > { %2981 = vrot.lane.b32.xlu0 %v5261_v56, %s4796_s2 }
 0xe8d   : > { %v4738_v37 = vpop.eup %4737 }
 0xe8e   : > { %v4740_v38 = vpop.eup %4739  ;;  %v2596_v42 = vmul.f32 %v4738_v37, %v4730_v16 }
 0xe8f   : > { %v2595_v39 = vmul.f32 %v4740_v38, %v4732_v6 }
 0xe91   : > { %4416 = vmatprep.mubr.msk.f32.mxu1 %vm1339_vm5, %v2595_v39 }
 0xe92   : > { %4417 = vmatmul.mubr.msk.f32.vlgmr.msra.gmra.mrb[26].mxu1 %vm1339_vm5, %v2596_v42 }
 0xef8   : > { %v2785_v43 = vpop.xlane.xlu0 %2784 }
 0xef9   : > { %4741 = vrcp.f32 %v2785_v43 }
 0xefc   : > { %v2788_v44 = vpop.xlane.xlu1 %2787  ;;  %v4651_v45 = vpop.permute.xlu0 %4650 }
 0xefd   : > { %4743 = vrcp.f32 %v2788_v44  ;;  %v4653_v46 = vunpack.i.h.bf16 %v4651_v45  ;;  %v4652_v47 = vunpack.i.l.bf16 %v4651_v45 }
 0xeff   : > { %v4561_v49 = vpack.c.bf16 %v4653_v46, %v4652_v47 }
 0xf00   : > { %v4656_v50 = vpop.permute.xlu1 %4655  ;;  %v2982_v4 = vpop.permute.xlu0 %2981 }
 0xf01   : > { %v4658_v51 = vunpack.i.h.bf16 %v4656_v50  ;;  %v4657_v52 = vunpack.i.l.bf16 %v4656_v50  ;;  %4562 = vmatprep.subr.bf16.mxu1 %v4561_v49 }
 0xf02   : > { %4564 = vmatpush3.bf16.msra.mxu1 %v4561_v49  ;;  %v4132_v49 = vld [vmem:[%s5521_s6 + $0x8] sm:$0xf] }
 0xf03   : > { %v4742_v34 = vpop.eup %4741  ;;  %v4565_v53 = vpack.c.bf16 %v4658_v51, %v4657_v52  ;;  %4439 = vmatprep.subr.bf16.mxu1 %v4793_v3  ;;  %v3186_v50 = vsel %vm1653_vm6, %v4132_v49, 0  ;;  %v4687_v49 = vld [vmem:[%s5003_s11] sm:$0xff]  }
 0xf04   : > { %v2791_v55 = vmul.f32 %v4742_v34, %v4734_v28  ;;  %v2980_v19 = vpop.permute.xlu1 %2979 }
 0xf05   : > { %4567 = vmatprep.subr.msk.bf16.mxu0 %vm5073_vm4, %v4565_v53 }
 0xf06   : > { %4430 = vmatprep.mubr.msk.f32.mxu1 %vm1339_vm5, %v2791_v55 }
 0xf07   : > { %v4744_v58 = vpop.eup %4743 }
 0xf08   : > { %v2792_v59 = vmul.f32 %v4744_v58, %v4736_v30 }
 0xf0a   : > { %4431 = vmatmul.mubr.msk.f32.vlgmr.msra.gmra.mrb[28].mxu1 %vm1339_vm5, %v2792_v59 }
 0xf0b   : > { %4440 = vmatpush3.bf16.msra.mxu1 %v2936_v60  ;;  %4441 = vmatprep.mubr.msk.bf16.mxu1 %vm4794_vm1, %v4793_v3 }
 0xf65   : > { %v4418_v61 = vpop.f32.mrb[26].mxu1 }
 0xf66   : > { %v2669_v62 = vpop.f32.mrb[27].mxu1 }
 0xf67   : > { %v2678_v63 = vpack.c.bf16 %v4418_v61, %v2669_v62 }
 0xf69   : > { %4442 = vmatmul.mubr.msk.bf16.vlgmr.msra.gmra.mrb[32].mxu1 %vm1251_vm3, %v2678_v63 }
 0xfdd   : > { %v4432_v0 = vpop.f32.mrb[28].mxu1 }
 0xfde   : > { %v2873_v1 = vpop.f32.mrb[29].mxu1 }
 0xfdf   : > { %v2882_v2 = vpack.c.bf16 %v4432_v0, %v2873_v1 }
 0xfe1   : > { %4436 = vmatmul.mubr.msk.bf16.vlgmr.msra.gmra.mrb[36].mxu0 %vm1251_vm3, %v2882_v2 }
 0xfe2   : > { %4570 = vmatpush3.bf16.xpose.msk.msra.mxu0 %vm5073_vm4, %v4565_v53  ;;  %4449 = vmatprep.mubr.msk.f32.mxu0 %vm1251_vm3, %v2980_v19 }
 0xfe3   : > { %4459 = vmatprep.subr.bf16.mxu0 %v4793_v3 }
 0xfe9   : > { %4450 = vmatmul.mubr.msk.f32.vlgmr.msra.gmra.mrb[34].mxu0 %vm1251_vm3, %v2982_v4 }
 0xfea   : > { %4461 = vmatprep.mubr.msk.bf16.mxu0 %vm4794_vm1, %v4793_v3  ;;  %4460 = vmatpush3.bf16.msra.mxu0 %v3186_v50  ;;  %v4688_v50 = vld [vmem:[%s5003_s11 + $0x8] sm:$0xff]  }
0x103c   : > { %v2972_v7 = vpop.f32.mrb[32].mxu1 }
0x103d   : > { %v4443_v8 = vpop.f32.mrb[33].mxu1 }
0x103e   : > { %v2975_v9 = vpop.f32.mrb[34].mxu1 }
0x103f   : > { %v4444_v21 = vpop.f32.mrb[35].mxu1 }
0x10b4   : > { %v2925_v10 = vpop.f32.mrb[36].mxu0 }
0x10b5   : > { %v5311_v11 = vadd.f32 %v2972_v7, %v2925_v10  ;;  %v4437_v12 = vpop.f32.mrb[37].mxu0 }
0x10b6   : > { %v2928_v13 = vpop.f32.mrb[38].mxu0 }
0x10b7   : > { %v5313_v14 = vadd.f32 %v2975_v9, %v2928_v13  ;;  %v4438_v5 = vpop.f32.mrb[39].mxu0 }
0x10bc   : > { %v4451_v16 = vpop.f32.mrb[34].mxu0 }
0x10bd   : > { %v3061_v6 = vpop.f32.mrb[35].mxu0  ;;  %v3073_v17 = vsel %vm1339_vm5, %v4451_v16, -inf }
0x10be   : > { %3074 = vmax.xlane.f32.xlu0 %v3073_v17  ;;  %v3070_v20 = vsel %vm1339_vm5, %v3061_v6, -inf }
0x10bf   : > { %3071 = vmax.xlane.f32.xlu1 %v3070_v20 }
0x114b   : > { %v3075_v22 = vpop.xlane.xlu0 %3074 }
0x114c   : > { %v3077_v23 = vsub.f32 %v4451_v16, %v3075_v22  ;;  %v3072_v24 = vpop.xlane.xlu1 %3071 }
0x114d   : > { %v3076_v25 = vsub.f32 %v3061_v6, %v3072_v24 }
0x114e   : > { %v3080_v26 = vmul.f32 1.442695, %v3077_v23 }
0x114f   : > { %v3078_v27 = vmul.f32 1.442695, %v3076_v25 }
0x1150   : > { %4745 = vpow2.f32 %v3080_v26 }
0x1151   : > { %4747 = vpow2.f32 %v3078_v27 }
0x115a   : > { %v4746_v28 = vpop.eup %4745 }
0x115b   : > { %v4748_v29 = vpop.eup %4747  ;;  %v3085_v30 = vsel %vm1339_vm5, %v4746_v28, 0.0 }
0x115c   : > { %3086 = vadd.xlane.f32.xlu1 %v3085_v30  ;;  %v3082_v31 = vsel %vm1339_vm5, %v4748_v29, 0.0 }
0x115d   : > { %3083 = vadd.xlane.f32.xlu0 %v3082_v31 }
0x116d   : > { %4665 = vrot.lane.b32.xlu1 %v5238_v48, %s4797_s26 }
0x1171   : > { %3231 = vrot.lane.b32.xlu1 %v5255_v54, %s4797_s26 }
0x1173   : > { %4660 = vrot.lane.b32.xlu0 %v5271_v18, %s4796_s2 }
0x1177   : > { %3233 = vrot.lane.b32.xlu0 %v5261_v56, %s4797_s26 }
0x11e9   : > { %v3087_v32 = vpop.xlane.xlu1 %3086 }
0x11ea   : > { %4749 = vrcp.f32 %v3087_v32  ;;  %v3084_v33 = vpop.xlane.xlu0 %3083 }
0x11eb   : > { %4751 = vrcp.f32 %v3084_v33 }
0x11ed   : > { %v4666_v35 = vpop.permute.xlu1 %4665 }
0x11ee   : > { %v4661_v36 = vpop.permute.xlu0 %4660  ;;  %v4668_v37 = vunpack.i.h.bf16 %v4666_v35  ;;  %v4667_v38 = vunpack.i.l.bf16 %v4666_v35 }
0x11ef   : > { %v4663_v39 = vunpack.i.h.bf16 %v4661_v36  ;;  %v4662_v42 = vunpack.i.l.bf16 %v4661_v36 }
0x11f0   : > { %v4575_v43 = vpack.c.bf16 %v4668_v37, %v4667_v38 }
0x11f1   : > { %v4571_v48 = vpack.c.bf16 %v4663_v39, %v4662_v42  ;;  %v3232_v46 = vpop.permute.xlu1 %3231 }
0x11f2   : > { %v3234_v47 = vpop.permute.xlu0 %3233 }
0x11f3   : > { %4572 = vmatprep.subr.bf16.mxu1 %v4571_v48 }
0x11f4   : > { %v4750_v54 = vpop.eup %4749  ;;  %4574 = vmatpush3.bf16.msra.mxu1 %v4571_v48 }
0x11f5   : > { %v4752_v44 = vpop.eup %4751  ;;  %4577 = vmatprep.subr.msk.bf16.mxu1 %vm5073_vm4, %v4575_v43  ;;  %v3091_v45 = vmul.f32 %v4750_v54, %v4746_v28  ;;  %v4142_v28 = vld [vmem:[%s5522_s29] ss:$0 sm:$0xff] }
0x11f6   : > { %v3090_v56 = vmul.f32 %v4752_v44, %v4748_v29 }
0x11f8   : > { %4456 = vmatprep.mubr.msk.f32.mxu1 %vm1339_vm5, %v3090_v56 }
0x11f9   : > { %4457 = vmatmul.mubr.msk.f32.vlgmr.msra.gmra.mrb[30].mxu1 %vm1339_vm5, %v3091_v45 }
0x11fa   : > { %4469 = vmatprep.mubr.msk.f32.mxu1 %vm1251_vm3, %v3232_v46 }
0x11fd   : > { %4580 = vmatpush3.bf16.xpose.msk.msra.mxu1 %vm5073_vm4, %v4575_v43 }
0x11fe   : > { %4479 = vmatprep.subr.bf16.mxu1 %v4793_v3 }
0x1204   : > { %4470 = vmatmul.mubr.msk.f32.vlgmr.msra.gmra.mrb[36].mxu1 %vm1251_vm3, %v3234_v47 }
0x1205   : > { %4481 = vmatprep.mubr.msk.bf16.mxu1 %vm4794_vm1, %v4793_v3 }
0x12cc   : > { %v4458_v51 = vpop.f32.mrb[30].mxu1 }
0x12cd   : > { %v3170_v52 = vpop.f32.mrb[31].mxu1 }
0x12ce   : > { %v3179_v34 = vpack.c.bf16 %v4458_v51, %v3170_v52  ;;  %v4689_v51 = vld [vmem:[%s5013_s27] sm:$0xff]   ;;  %v4690_v52 = vld [vmem:[%s5013_s27 + $0x8] sm:$0xff]  }
0x12d0   : > { %4462 = vmatmul.mubr.msk.bf16.vlgmr.msra.gmra.mrb[40].mxu0 %vm1251_vm3, %v3179_v34 }
0x12d7   : > { %v4471_v53 = vpop.f32.mrb[36].mxu1 }
0x12d8   : > { %v3313_v15 = vpop.f32.mrb[37].mxu1  ;;  %v3325_v55 = vsel %vm1339_vm5, %v4471_v53, -inf }
0x12d9   : > { %3326 = vmax.xlane.f32.xlu0 %v3325_v55  ;;  %v3322_v57 = vsel %vm1339_vm5, %v3313_v15, -inf }
0x12da   : > { %3323 = vmax.xlane.f32.xlu1 %v3322_v57 }
0x1366   : > { %v3327_v58 = vpop.xlane.xlu0 %3326 }
0x1367   : > { %v3329_v59 = vsub.f32 %v4471_v53, %v3327_v58  ;;  %v3324_v60 = vpop.xlane.xlu1 %3323 }
0x1368   : > { %v3328_v61 = vsub.f32 %v3313_v15, %v3324_v60 }
0x1369   : > { %v3332_v62 = vmul.f32 1.442695, %v3329_v59 }
0x136a   : > { %v3330_v63 = vmul.f32 1.442695, %v3328_v61 }
0x136b   : > { %4753 = vpow2.f32 %v3332_v62 }
0x136c   : > { %4755 = vpow2.f32 %v3330_v63 }
0x1375   : > { %v4754_v0 = vpop.eup %4753 }
0x1376   : > { %v4756_v1 = vpop.eup %4755  ;;  %v3337_v2 = vsel %vm1339_vm5, %v4754_v0, 0.0 }
0x1377   : > { %3338 = vadd.xlane.f32.xlu1 %v3337_v2  ;;  %v3334_v19 = vsel %vm1339_vm5, %v4756_v1, 0.0 }
0x1378   : > { %3335 = vadd.xlane.f32.xlu0 %v3334_v19 }
0x138e   : > { %4670 = vrot.lane.b32.xlu0 %v5271_v18, %s4797_s26  ;;  %s5523_s26 = sld [smem:[#allocation20_spill]] }
0x1394   : > { %s5524_s25 = scalar_lea.vmem %s5523_s26, %s4935_s4 }
0x1395   : > { %v4143_v61 = vld [vmem:[%s5524_s25] ss:$0 sm:$0xff] }
0x13a3   : > { %v3222_v4 = vpop.f32.mrb[40].mxu0 }
0x13a4   : > { %v3229_v7 = vadd.f32 %v3222_v4, %v5311_v11  ;;  %v4463_v8 = vpop.f32.mrb[41].mxu0 }
0x13a5   : > { %v3225_v9 = vpop.f32.mrb[42].mxu0  ;;  %v4691_v8 = vld [vmem:[%s5013_s27 + $0x10] sm:$0xff]  }
0x13a6   : > { %v3230_v21 = vadd.f32 %v3225_v9, %v5313_v14  ;;  %v4464_v10 = vpop.f32.mrb[43].mxu0  ;;  %v4140_v14 = vld [vmem:[%s5521_s6 + $0xc] sm:$0xf]  ;;  %v4692_v9 = vld [vmem:[%s5013_s27 + $0x18] sm:$0xff]  }
0x13a7   : > { %v3438_v23 = vsel %vm1653_vm6, %v4140_v14, 0 }
0x13a8   : > { %4480 = vmatpush3.bf16.msra.mxu1 %v3438_v23 }
0x13a9   : > { %4493 = vmatprep.subr.bf16.mxu1 %v4793_v3 }
0x1404   : > { %v3339_v12 = vpop.xlane.xlu1 %3338 }
0x1405   : > { %4757 = vrcp.f32 %v3339_v12  ;;  %v3336_v13 = vpop.xlane.xlu0 %3335 }
0x1406   : > { %4759 = vrcp.f32 %v3336_v13 }
0x1409   : > { %v4671_v5 = vpop.permute.xlu0 %4670 }
0x140a   : > { %v4673_v16 = vunpack.i.h.bf16 %v4671_v5  ;;  %v4672_v6 = vunpack.i.l.bf16 %v4671_v5 }
0x140c   : > { %v4581_v17 = vpack.c.bf16 %v4673_v16, %v4672_v6 }
0x140e   : > { %4582 = vmatprep.subr.bf16.mxu0 %v4581_v17 }
0x140f   : > { %v4758_v20 = vpop.eup %4757  ;;  %4584 = vmatpush3.bf16.msra.mxu0 %v4581_v17 }
0x1410   : > { %v4760_v18 = vpop.eup %4759  ;;  %4485 = vmatprep.subr.bf16.mxu0 %v4793_v3  ;;  %v3343_v22 = vmul.f32 %v4758_v20, %v4754_v0 }
0x1411   : > { %v3342_v11 = vmul.f32 %v4760_v18, %v4756_v1  ;;  %v4144_v1 = vld [vmem:[%s5526_s5] ss:$0 sm:$0xff] }
0x1413   : > { %4476 = vmatprep.mubr.msk.f32.mxu0 %vm1339_vm5, %v3342_v11 }
0x1414   : > { %4477 = vmatmul.mubr.msk.f32.vlgmr.msra.gmra.mrb[44].mxu0 %vm1339_vm5, %v3343_v22 }
0x1415   : > { %4489 = vmatprep.mubr.msk.bf16.mxu0 %vm4794_vm1, %v4793_v3  ;;  %4486 = vmatpush3.bf16.msra.mxu0 %v4687_v49 }
0x1416   : > { %4487 = vmatprep.subr.bf16.mxu0 %v4793_v3 }
0x1419   : > { %4488 = vmatpush3.bf16.msra.mxu0 %v4688_v50 }
0x14e7   : > { %v4478_v24 = vpop.f32.mrb[44].mxu0 }
0x14e8   : > { %v3422_v25 = vpop.f32.mrb[45].mxu0 }
0x14e9   : > { %v3431_v26 = vpack.c.bf16 %v4478_v24, %v3422_v25 }
0x14eb   : > { %4482 = vmatmul.mubr.msk.bf16.vlgmr.msra.gmra.mrb[40].mxu1 %vm1251_vm3, %v3431_v26 }
0x14ec   : > { %4501 = vmatprep.mubr.msk.bf16.mxu1 %vm4794_vm1, %v4793_v3  ;;  %4494 = vmatpush3.bf16.msra.mxu1 %v4689_v51 }
0x14ed   : > { %4495 = vmatprep.subr.bf16.mxu1 %v4793_v3 }
0x14f0   : > { %4496 = vmatpush3.bf16.msra.mxu1 %v4690_v52 }
0x14f1   : > { %4497 = vmatprep.subr.bf16.mxu1 %v4793_v3 }
0x14f4   : > { %4498 = vmatpush3.bf16.msra.mxu1 %v4691_v8 }
0x14f5   : > { %4499 = vmatprep.subr.bf16.mxu1 %v4793_v3  ;;  %v4149_v3 = vld [vmem:[%s1048_s10] ss:$0 sm:$0xff] }
0x14f8   : > { %4500 = vmatpush3.bf16.msra.mxu1 %v4692_v9 }
0x15be   : > { %v3474_v27 = vpop.f32.mrb[40].mxu1 }
0x15bf   : > { %v3481_v29 = vadd.f32 %v3474_v27, %v3229_v7  ;;  %v4483_v30 = vpop.f32.mrb[41].mxu1 }
0x15c0   : > { %v3477_v31 = vpop.f32.mrb[42].mxu1 }
0x15c1   : > { %v3490_v32 = vadd.f32 %v4142_v28, %v3481_v29  ;;  %v3482_v33 = vadd.f32 %v3477_v31, %v3230_v21  ;;  %v4484_v35 = vpop.f32.mrb[43].mxu1  ;;  %v4145_v21 = vld [vmem:[%s5527_s19] ss:$0 sm:$0xff] }
0x15c3   : > { %v3491_v36 = vadd.f32 %v4142_v28, %v3482_v33  ;;  %v3492_v37 = vadd.f32 %v3490_v32, %v5229_v40 }
0x15c5   : > { %v3494_v38 = vsel %vm1092_vm2, %v3492_v37, 0.0  ;;  %v3493_v39 = vadd.f32 %v3491_v36, %v5231_v41 }
0x15c6   : > { %3495 = vadd.xlane.f32.xlu1 %v3494_v38 }
0x15c7   : > { %v3497_v42 = vsel %vm1092_vm2, %v3493_v39, 0.0 }
0x15ca   : > { %3498 = vadd.xlane.f32.xlu1 %v3497_v42 }
0x1653   : > { %v3496_v48 = vpop.xlane.xlu1 %3495 }
0x1654   : > { %v3500_v43 = vmul.f32 0.03125, %v3496_v48 }
0x1656   : > { %v3502_v54 = vsub.f32 %v3492_v37, %v3500_v43 }
0x1657   : > { %v3499_v44 = vpop.xlane.xlu1 %3498 }
0x1658   : > { %v3501_v56 = vmul.f32 0.03125, %v3499_v44  ;;  %v3504_v45 = vmul.f32 %v3502_v54, %v3502_v54 }
0x165a   : > { %v3503_v46 = vsub.f32 %v3493_v39, %v3501_v56  ;;  %v3506_v40 = vsel %vm1092_vm2, %v3504_v45, 0.0 }
0x165b   : > { %3507 = vadd.xlane.f32.xlu1 %v3506_v40  ;;  %v4155_v40 = vld [vmem:[%s1051_s23] ss:$0 sm:$0xff] }
0x165c   : > { %v3505_v47 = vmul.f32 %v3503_v46, %v3503_v46 }
0x165e   : > { %v3509_v41 = vsel %vm1092_vm2, %v3505_v47, 0.0 }
0x165f   : > { %3510 = vadd.xlane.f32.xlu1 %v3509_v41  ;;  %v4156_v41 = vld [vmem:[%s1054_s14] ss:$0 sm:$0xff] }
0x16e8   : > { %v3508_v34 = vpop.xlane.xlu1 %3507 }
0x16e9   : > { %v3512_v53 = vmul.f32 0.03125, %v3508_v34 }
0x16eb   : > { %v3514_v15 = vadd.f32 1e-05, %v3512_v53 }
0x16ec   : > { %v3511_v55 = vpop.xlane.xlu1 %3510 }
0x16ed   : > { %4761 = vrsqrt.f32 %v3514_v15  ;;  %v3513_v57 = vmul.f32 0.03125, %v3511_v55 }
0x16ef   : > { %v3515_v58 = vadd.f32 1e-05, %v3513_v57 }
0x16f1   : > { %4763 = vrsqrt.f32 %v3515_v58 }
0x16f7   : > { %v4762_v59 = vpop.eup %4761 }
0x16f8   : > { %v3518_v60 = vmul.f32 %v4762_v59, %v3502_v54 }
0x16fa   : > { %v3527_v63 = vmul.f32 %v4143_v61, %v3518_v60 }
0x16fb   : > { %v4764_v62 = vpop.eup %4763 }
0x16fc   : > { %v3519_v0 = vmul.f32 %v4764_v62, %v3503_v46  ;;  %v3536_v19 = vadd.f32 %v4144_v1, %v3527_v63 }
0x16fe   : > { %v3528_v2 = vmul.f32 %v4143_v61, %v3519_v0 }
0x1700   : > { %v3537_v4 = vadd.f32 %v4144_v1, %v3528_v2 }
0x1702   : > { %v3538_v7 = vpack.c.bf16 %v3537_v4, %v3536_v19 }
0x1704   : > { %4490 = vmatmul.mubr.msk.bf16.vlgmr.msra.gmra.mrb[48].mxu0 %vm1092_vm2, %v3538_v7 }
0x17d7   : > { %v3599_v10 = vpop.f32.mrb[48].mxu0 }
0x17d8   : > { %v3600_v12 = vadd.f32 %v4145_v21, %v3599_v10  ;;  %v4491_v13 = vpop.f32.mrb[49].mxu0 }
0x17d9   : > { %v3602_v5 = vpop.f32.mrb[50].mxu0 }
0x17da   : > { %v3603_v16 = vadd.f32 %v4145_v21, %v3602_v5  ;;  %v4492_v6 = vpop.f32.mrb[51].mxu0  ;;  %v3606_v17 = vmax.f32 %v3600_v12, 0.0 }
0x17dc   : > { %v3607_v20 = vmax.f32 %v3603_v16, 0.0 }
0x17de   : > { %v3608_v18 = vpack.c.bf16 %v3607_v20, %v3606_v17 }
0x17e0   : > { %4502 = vmatmul.mubr.msk.bf16.vlgmr.msra.gmra.mrb[44].mxu1 %vm3648_vm7, %v3608_v18 }
0x18b3   : > { %v3686_v11 = vpop.f32.mrb[44].mxu1 }
0x18b4   : > { %v3687_v22 = vadd.f32 %v4149_v3, %v3686_v11  ;;  %v4503_v14 = vpop.f32.mrb[45].mxu1 }
0x18b5   : > { %v3689_v23 = vpop.f32.mrb[46].mxu1 }
0x18b6   : > { %v3690_v24 = vadd.f32 %v4149_v3, %v3689_v23  ;;  %v4504_v25 = vpop.f32.mrb[47].mxu1  ;;  %v3693_v26 = vadd.f32 %v3687_v22, %v3536_v19 }
0x18b8   : > { %v3695_v27 = vsel %vm1092_vm2, %v3693_v26, 0.0  ;;  %v3694_v28 = vadd.f32 %v3690_v24, %v3537_v4 }
0x18b9   : > { %3696 = vadd.xlane.f32.xlu1 %v3695_v27 }
0x18ba   : > { %v3698_v29 = vsel %vm1092_vm2, %v3694_v28, 0.0 }
0x18bd   : > { %3699 = vadd.xlane.f32.xlu1 %v3698_v29 }
0x1946   : > { %v3697_v30 = vpop.xlane.xlu1 %3696 }
0x1947   : > { %v3701_v31 = vmul.f32 0.03125, %v3697_v30 }
0x1949   : > { %v3703_v32 = vsub.f32 %v3693_v26, %v3701_v31 }
0x194a   : > { %v3700_v33 = vpop.xlane.xlu1 %3699 }
0x194b   : > { %v3702_v35 = vmul.f32 0.03125, %v3700_v33  ;;  %v3705_v36 = vmul.f32 %v3703_v32, %v3703_v32 }
0x194d   : > { %v3704_v37 = vsub.f32 %v3694_v28, %v3702_v35  ;;  %v3707_v38 = vsel %vm1092_vm2, %v3705_v36, 0.0 }
0x194e   : > { %3708 = vadd.xlane.f32.xlu0 %v3707_v38 }
0x194f   : > { %v3706_v39 = vmul.f32 %v3704_v37, %v3704_v37 }
0x1951   : > { %v3710_v42 = vsel %vm1092_vm2, %v3706_v39, 0.0 }
0x1952   : > { %3711 = vadd.xlane.f32.xlu1 %v3710_v42 }
0x19db   : > { %v3709_v48 = vpop.xlane.xlu0 %3708 }
0x19dc   : > { %v3713_v43 = vmul.f32 0.03125, %v3709_v48 }
0x19de   : > { %v3715_v54 = vadd.f32 1e-05, %v3713_v43 }
0x19df   : > { %v3712_v44 = vpop.xlane.xlu1 %3711 }
0x19e0   : > { %4765 = vrsqrt.f32 %v3715_v54  ;;  %v3714_v56 = vmul.f32 0.03125, %v3712_v44 }
0x19e2   : > { %v3716_v45 = vadd.f32 1e-05, %v3714_v56 }
0x19e4   : > { %4767 = vrsqrt.f32 %v3716_v45 }
0x19ea   : > { %v4766_v46 = vpop.eup %4765 }
0x19eb   : > { %v3719_v47 = vmul.f32 %v4766_v46, %v3703_v32 }
0x19ed   : > { %v3728_v49 = vmul.f32 %v4155_v40, %v3719_v47 }
0x19ee   : > { %v4768_v50 = vpop.eup %4767 }
0x19ef   : > { %v3737_v51 = vadd.f32 %v4156_v41, %v3728_v49  ;;  %v3720_v52 = vmul.f32 %v4768_v50, %v3704_v37 }
0x19f1   : > { %3739 = vst.msk [vmem:[%s5511_s18] sm:$0xff] %vm1092_vm2, %v3737_v51  ;;  %v3729_v34 = vmul.f32 %v4155_v40, %v3720_v52 }
0x19f3   : > { %v3738_v53 = vadd.f32 %v4156_v41, %v3729_v34 }
0x19f5   : > { %3740 = vst.msk [vmem:[%s5511_s18 + $0x8] sm:$0xff] %vm1092_vm2, %v3738_v53 }
0x19f6 PF: > { %s5531_s11 = sld [smem:[#allocation4_spill]]  ;;  %s5532_s3 = sld [smem:[#allocation3_spill]] }
0x19f7   : > { %s5533_s28 = sld [smem:[#allocation5_spill]] }
0x19fc   : > { %s32_s29 = sadd.s32 1, %s5531_s11  }
0x19fd   : > { %p29_p6 = scmp.ge.s32.totalorder %s32_s29, 4  }
0x19ff   :  { %31 = sbr.rel (!%p29_p6) target bundleno = 21 (0x15), region = 211 }

</bundles_post_ra>
